<compile_context>
chip_gen: v5e
topology: v5e:2x2
jax: 0.10.0
libtpu: 0.0.40
codegen_flags: <defaults>
</compile_context>

<pallas_src>
import functools

import jax
import jax.numpy as jnp
from jax.experimental import pallas as pl
from jax.experimental.pallas import tpu as pltpu


# ----------------------------------------------------------------------------
# Hardware-aware knobs (resolved once, outside jit)
# ----------------------------------------------------------------------------
_CAPS = {"resolved": False, "weight_mode": None, "batched_heads": False}


@functools.lru_cache(maxsize=None)
def _vmem_limit_bytes():
    cap = 64 * 1024 * 1024
    try:
        cap = int(getattr(pltpu.get_tpu_info(), "vmem_capacity_bytes", cap))
    except Exception:
        pass
    # ~75% of physical VMEM, clamped: ~96 MiB on 128 MiB parts, ~48 MiB on v7x.
    return max(32 * 1024 * 1024, min((cap * 3) // 4, 112 * 1024 * 1024))


def _cparams(semantics):
    return pltpu.CompilerParams(dimension_semantics=semantics,
                                vmem_limit_bytes=_vmem_limit_bytes())


def _wspec(shape, index_map):
    """BlockSpec for constant-index (weight/bias) blocks: single-buffered if supported."""
    mode = _CAPS["weight_mode"]
    if mode is None:
        return pl.BlockSpec(shape, index_map)
    return pl.BlockSpec(shape, index_map, pipeline_mode=mode)


def _row_tile(m):
    target = 1024 if _vmem_limit_bytes() >= 64 * 1024 * 1024 else 512
    if m <= target:
        return m
    for t in (target, 512, 256, 128, 64, 32, 16, 8):
        if t <= target and m % t == 0:
            return t
    return m


def _seq_tile(n, target=256):
    if n <= target:
        return n
    for t in (target, 128, 64, 32, 16, 8):
        if n % t == 0:
            return t
    return n


def _f_tile(f, target=2048):
    if f <= target:
        return f
    for t in (target, 1024, 512, 256, 128):
        if f % t == 0:
            return t
    return f


def _layernorm(y, g, b):
    mu = jnp.mean(y, axis=-1, keepdims=True)
    var = jnp.mean(jnp.square(y - mu), axis=-1, keepdims=True)
    return (y - mu) * jax.lax.rsqrt(var + 1e-5) * g + b


def resolve_tpu_caps(seq_len=8, d_model=32, nhead=4):
    """Probe optional Mosaic features once (must be called OUTSIDE jit)."""
    if _CAPS["resolved"]:
        return
    _CAPS["resolved"] = True

    # (a) Buffered(1) single-buffering for constant-index weight blocks.
    def _probe_buf_kernel(x_ref, o_ref):
        o_ref[...] = x_ref[...] + 1.0

    try:
        f = pl.pallas_call(
            _probe_buf_kernel,
            grid=(2,),
            in_specs=[pl.BlockSpec((8, 128), lambda i: (0, 0),
                                   pipeline_mode=pl.Buffered(1))],
            out_specs=pl.BlockSpec((8, 128), lambda i: (0, 0)),
            out_shape=jax.ShapeDtypeStruct((8, 128), jnp.float32),
        )
        jax.block_until_ready(f(jnp.ones((8, 128), jnp.float32)))
        _CAPS["weight_mode"] = pl.Buffered(1)
    except Exception:
        _CAPS["weight_mode"] = None

    # (b) head-batched attention core (in-kernel reshape/transpose + batched dots).
    dh = max(d_model // max(nhead, 1), 1)
    d = dh * nhead

    def _probe_bh_kernel(x_ref, o_ref):
        x = x_ref[...]
        n = x.shape[0]
        x3 = jnp.transpose(x.reshape(n, nhead, dh), (1, 0, 2))
        s = jnp.einsum("hqd,hkd->hqk", x3, x3, preferred_element_type=jnp.float32)
        c = jnp.einsum("hqk,hkd->hqd", s.astype(jnp.bfloat16), x3,
                       preferred_element_type=jnp.float32)
        o_ref[...] = jnp.transpose(c.astype(jnp.bfloat16),
                                   (1, 0, 2)).reshape(n, d).astype(o_ref.dtype)

    try:
        f = pl.pallas_call(
            _probe_bh_kernel,
            out_shape=jax.ShapeDtypeStruct((seq_len, d), jnp.float32),
        )
        jax.block_until_ready(f(jnp.ones((seq_len, d), jnp.bfloat16)))
        _CAPS["batched_heads"] = True
    except Exception:
        _CAPS["batched_heads"] = False


# ----------------------------------------------------------------------------
# Kernel: input projection + positional encoding, tiled over (batch, seq)
# ----------------------------------------------------------------------------
def _inproj_pe_kernel(x_ref, w_ref, b_ref, pe_ref, o_ref):
    h = jnp.dot(x_ref[0], w_ref[...], preferred_element_type=jnp.float32)
    o_ref[0] = (h + b_ref[...] + pe_ref[...]).astype(o_ref.dtype)


def input_proj_pe(x, w, b, pe):
    B, N, W = x.shape
    D = w.shape[1]
    tn = _seq_tile(N)
    return pl.pallas_call(
        _inproj_pe_kernel,
        grid=(B, pl.cdiv(N, tn)),
        in_specs=[
            pl.BlockSpec((1, tn, W), lambda bi, j: (bi, j, 0)),
            _wspec((W, D), lambda bi, j: (0, 0)),
            _wspec((1, D), lambda bi, j: (0, 0)),
            pl.BlockSpec((tn, D), lambda bi, j: (j, 0)),
        ],
        out_specs=pl.BlockSpec((1, tn, D), lambda bi, j: (bi, j, 0)),
        out_shape=jax.ShapeDtypeStruct((B, N, D), jnp.bfloat16),
        compiler_params=_cparams(("parallel", "parallel")),
    )(x, w, b.reshape(1, D), pe)


# ----------------------------------------------------------------------------
# Kernel: fused self-attention block
#   qkv = x @ Wqkv + b ; per-head softmax(QK^T)V ; out-proj ; +residual ; LN1
# ----------------------------------------------------------------------------
def _attn_block_kernel(x_ref, wqkv_ref, bqkv_ref, wo_ref, bo_ref,
                       g_ref, be_ref, o_ref, *, nhead, scale, batched):
    x_bf = x_ref[0]                                           # (N, D) bf16
    N, D = x_bf.shape
    Dh = D // nhead

    qkv = jnp.dot(x_bf, wqkv_ref[...],
                  preferred_element_type=jnp.float32) + bqkv_ref[...]   # (N, 3D) f32
    # Single f32->bf16 cast pass over qkv; softmax scale folded into q.
    q = (qkv[:, :D] * scale).astype(jnp.bfloat16)
    k = qkv[:, D:2 * D].astype(jnp.bfloat16)
    v = qkv[:, 2 * D:].astype(jnp.bfloat16)

    if batched:
        # Head-batched contraction: 2 MXU calls instead of 2*nhead tiny ones.
        q3 = jnp.transpose(q.reshape(N, nhead, Dh), (1, 0, 2))
        k3 = jnp.transpose(k.reshape(N, nhead, Dh), (1, 0, 2))
        v3 = jnp.transpose(v.reshape(N, nhead, Dh), (1, 0, 2))
        s = jnp.einsum("hqd,hkd->hqk", q3, k3, preferred_element_type=jnp.float32)
        s = s - jnp.max(s, axis=-1, keepdims=True)
        p = jnp.exp(s)
        p = p * pl.reciprocal(jnp.sum(p, axis=-1, keepdims=True), approx=True)
        ctx = jnp.einsum("hqk,hkd->hqd", p.astype(jnp.bfloat16), v3,
                         preferred_element_type=jnp.float32)
        attn = jnp.transpose(ctx.astype(jnp.bfloat16), (1, 0, 2)).reshape(N, D)
    else:
        # Fallback path (statically unrolled per head).
        heads = []
        for h in range(nhead):
            sl = slice(h * Dh, (h + 1) * Dh)
            s = jax.lax.dot_general(q[:, sl], k[:, sl], (((1,), (1,)), ((), ())),
                                    preferred_element_type=jnp.float32)
            s = s - jnp.max(s, axis=-1, keepdims=True)
            p = jnp.exp(s)
            p = p * pl.reciprocal(jnp.sum(p, axis=-1, keepdims=True), approx=True)
            heads.append(jnp.dot(p.astype(jnp.bfloat16), v[:, sl],
                                 preferred_element_type=jnp.float32))
        attn = jnp.concatenate(heads, axis=-1).astype(jnp.bfloat16)

    proj = jnp.dot(attn, wo_ref[...], preferred_element_type=jnp.float32) + bo_ref[...]
    y = proj + x_bf.astype(jnp.float32)                       # residual (dropout=id, eval)
    o_ref[0] = _layernorm(y, g_ref[...], be_ref[...]).astype(o_ref.dtype)


def attention_block(x, wqkv, bqkv, wo, bo, g, b, nhead):
    B, N, D = x.shape
    assert D % nhead == 0
    scale = 1.0 / ((D // nhead) ** 0.5)
    kern = functools.partial(_attn_block_kernel, nhead=nhead, scale=scale,
                             batched=_CAPS["batched_heads"])
    return pl.pallas_call(
        kern,
        grid=(B,),
        in_specs=[
            pl.BlockSpec((1, N, D), lambda i: (i, 0, 0)),
            _wspec((D, 3 * D), lambda i: (0, 0)),
            _wspec((1, 3 * D), lambda i: (0, 0)),
            _wspec((D, D), lambda i: (0, 0)),
            _wspec((1, D), lambda i: (0, 0)),
            _wspec((1, D), lambda i: (0, 0)),
            _wspec((1, D), lambda i: (0, 0)),
        ],
        out_specs=pl.BlockSpec((1, N, D), lambda i: (i, 0, 0)),
        out_shape=jax.ShapeDtypeStruct((B, N, D), jnp.bfloat16),
        compiler_params=_cparams(("parallel",)),
    )(x, wqkv, bqkv.reshape(1, 3 * D), wo, bo.reshape(1, D),
      g.reshape(1, D), b.reshape(1, D))


# ----------------------------------------------------------------------------
# Kernel: fused FFN block, F-dim tiled with f32 accumulator
#   relu(x@W1+b1)@W2+b2 ; +residual ; LN2
# ----------------------------------------------------------------------------
def _ffn_ln_kernel(x_ref, w1_ref, b1_ref, w2_ref, b2_ref, g_ref, be_ref,
                   o_ref, acc_ref):
    f = pl.program_id(1)

    @pl.when(f == 0)
    def _():
        acc_ref[...] = jnp.zeros_like(acc_ref)

    x_bf = x_ref[...]                                         # (tm, D) bf16
    h = jnp.dot(x_bf, w1_ref[...], preferred_element_type=jnp.float32) + b1_ref[...]
    h = jnp.maximum(h, 0.0)                                   # ReLU (PyTorch default)
    acc_ref[...] += jnp.dot(h.astype(jnp.bfloat16), w2_ref[...],
                            preferred_element_type=jnp.float32)

    @pl.when(f == pl.num_programs(1) - 1)
    def _():
        y = acc_ref[...] + b2_ref[...] + x_bf.astype(jnp.float32)
        o_ref[...] = _layernorm(y, g_ref[...], be_ref[...]).astype(o_ref.dtype)


def ffn_block(x2d, w1, b1, w2, b2, g, b):
    M, D = x2d.shape
    F = w1.shape[1]
    tm = _row_tile(M)
    tf = _f_tile(F)
    return pl.pallas_call(
        _ffn_ln_kernel,
        grid=(pl.cdiv(M, tm), pl.cdiv(F, tf)),
        in_specs=[
            pl.BlockSpec((tm, D), lambda i, f: (i, 0)),
            pl.BlockSpec((D, tf), lambda i, f: (0, f)),
            pl.BlockSpec((1, tf), lambda i, f: (0, f)),
            pl.BlockSpec((tf, D), lambda i, f: (f, 0)),
            _wspec((1, D), lambda i, f: (0, 0)),
            _wspec((1, D), lambda i, f: (0, 0)),
            _wspec((1, D), lambda i, f: (0, 0)),
        ],
        out_specs=pl.BlockSpec((tm, D), lambda i, f: (i, 0)),
        out_shape=jax.ShapeDtypeStruct((M, D), jnp.bfloat16),
        scratch_shapes=[pltpu.VMEM((tm, D), jnp.float32)],
        compiler_params=_cparams(("parallel", "arbitrary")),
    )(x2d, w1, b1.reshape(1, F), w2, b2.reshape(1, D),
      g.reshape(1, D), b.reshape(1, D))


# ----------------------------------------------------------------------------
# Kernel: last-encoder-layer FFN + LN2 + mean-pool (keepdim) fused
#   (the per-token output of the last layer never touches HBM)
# ----------------------------------------------------------------------------
def _ffn_ln_pool_kernel(x_ref, w1_ref, b1_ref, w2_ref, b2_ref, g_ref, be_ref,
                        o_ref, acc_ref, *, inv_n):
    f = pl.program_id(1)

    @pl.when(f == 0)
    def _():
        acc_ref[...] = jnp.zeros_like(acc_ref)

    x_bf = x_ref[0]                                           # (N, D) bf16
    h = jnp.dot(x_bf, w1_ref[...], preferred_element_type=jnp.float32) + b1_ref[...]
    h = jnp.maximum(h, 0.0)
    acc_ref[...] += jnp.dot(h.astype(jnp.bfloat16), w2_ref[...],
                            preferred_element_type=jnp.float32)

    @pl.when(f == pl.num_programs(1) - 1)
    def _():
        y = acc_ref[...] + b2_ref[...] + x_bf.astype(jnp.float32)
        y = _layernorm(y, g_ref[...], be_ref[...])
        o_ref[0] = (jnp.sum(y, axis=0, keepdims=True) * inv_n).astype(o_ref.dtype)


def ffn_ln_pool_block(x, w1, b1, w2, b2, g, b):
    B, N, D = x.shape
    F = w1.shape[1]
    tf = _f_tile(F)
    kern = functools.partial(_ffn_ln_pool_kernel, inv_n=1.0 / N)
    return pl.pallas_call(
        kern,
        grid=(B, pl.cdiv(F, tf)),
        in_specs=[
            pl.BlockSpec((1, N, D), lambda bi, f: (bi, 0, 0)),
            pl.BlockSpec((D, tf), lambda bi, f: (0, f)),
            pl.BlockSpec((1, tf), lambda bi, f: (0, f)),
            pl.BlockSpec((tf, D), lambda bi, f: (f, 0)),
            _wspec((1, D), lambda bi, f: (0, 0)),
            _wspec((1, D), lambda bi, f: (0, 0)),
            _wspec((1, D), lambda bi, f: (0, 0)),
        ],
        out_specs=pl.BlockSpec((1, 1, D), lambda bi, f: (bi, 0, 0)),
        out_shape=jax.ShapeDtypeStruct((B, 1, D), jnp.float32),
        scratch_shapes=[pltpu.VMEM((N, D), jnp.float32)],
        compiler_params=_cparams(("parallel", "arbitrary")),
    )(x, w1, b1.reshape(1, F), w2, b2.reshape(1, D),
      g.reshape(1, D), b.reshape(1, D))


# ----------------------------------------------------------------------------
# Kernel: plain linear, tiled over rows (encoder out-proj, decoder in-proj / head)
# ----------------------------------------------------------------------------
def _linear_kernel(x_ref, w_ref, b_ref, o_ref):
    o_ref[...] = (jnp.dot(x_ref[...], w_ref[...],
                          preferred_element_type=jnp.float32)
                  + b_ref[...]).astype(o_ref.dtype)


def linear_tiled(x2d, w, b, out_dtype=jnp.float32):
    M, D = x2d.shape
    W = w.shape[1]
    tm = _row_tile(M)
    return pl.pallas_call(
        _linear_kernel,
        grid=(pl.cdiv(M, tm),),
        in_specs=[
            pl.BlockSpec((tm, D), lambda i: (i, 0)),
            _wspec((D, W), lambda i: (0, 0)),
            _wspec((1, W), lambda i: (0, 0)),
        ],
        out_specs=pl.BlockSpec((tm, W), lambda i: (i, 0)),
        out_shape=jax.ShapeDtypeStruct((M, W), out_dtype),
        compiler_params=_cparams(("parallel",)),
    )(x2d, w, b.reshape(1, W))


# ----------------------------------------------------------------------------
# Kernel: broadcast projected Z over the sequence (+PE) — replaces Z.repeat(1,n,1)
# ----------------------------------------------------------------------------
def _broadcast_pe_kernel(z_ref, pe_ref, o_ref):
    o_ref[0] = (z_ref[0] + pe_ref[...]).astype(o_ref.dtype)


def broadcast_pe(zproj, pe):
    B = zproj.shape[0]
    N, D = pe.shape
    tn = _seq_tile(N)
    return pl.pallas_call(
        _broadcast_pe_kernel,
        grid=(B, pl.cdiv(N, tn)),
        in_specs=[
            pl.BlockSpec((1, 1, D), lambda bi, j: (bi, 0, 0)),
            pl.BlockSpec((tn, D), lambda bi, j: (j, 0)),
        ],
        out_specs=pl.BlockSpec((1, tn, D), lambda bi, j: (bi, j, 0)),
        out_shape=jax.ShapeDtypeStruct((B, N, D), jnp.bfloat16),
        compiler_params=_cparams(("parallel", "parallel")),
    )(zproj, pe)


# ----------------------------------------------------------------------------
# Model glue (parameter plumbing in plain JAX)
# ----------------------------------------------------------------------------
def sinusoidal_pe(length, d_model):
    pos = jnp.arange(length, dtype=jnp.float32)[:, None]
    i = jnp.arange(d_model // 2, dtype=jnp.float32)[None, :]
    div = jnp.exp(-jnp.log(10000.0) * (2.0 * i) / d_model)
    pe = jnp.zeros((length, d_model), jnp.float32)
    pe = pe.at[:, 0::2].set(jnp.sin(pos * div))
    pe = pe.at[:, 1::2].set(jnp.cos(pos * div))
    return pe


def transformer_layer(x, p, nhead):
    B, N, D = x.shape
    h = attention_block(x, p["wqkv"], p["bqkv"], p["wo"], p["bo"],
                        p["ln1_g"], p["ln1_b"], nhead)
    # TODO(synk): for mem-bound configs the FFN could be fused into the attention
    # kernel epilogue to avoid one (B,N,D) bf16 HBM round trip per layer.
    h = ffn_block(h.reshape(B * N, D), p["w1"], p["b1"], p["w2"], p["b2"],
                  p["ln2_g"], p["ln2_b"])
    return h.reshape(B, N, D)


def encoder_forward(p, X, nhead):
    B, N, _ = X.shape
    D = p["in_w"].shape[1]
    assert N <= p["pe"].shape[0]
    pe = p["pe"][:N]
    h = input_proj_pe(X.astype(jnp.bfloat16), p["in_w"], p["in_b"], pe)
    for lp in p["layers"][:-1]:
        h = transformer_layer(h, lp, nhead)
    lp = p["layers"][-1]
    h = attention_block(h, lp["wqkv"], lp["bqkv"], lp["wo"], lp["bo"],
                        lp["ln1_g"], lp["ln1_b"], nhead)
    pooled = ffn_ln_pool_block(h, lp["w1"], lp["b1"], lp["w2"], lp["b2"],
                               lp["ln2_g"], lp["ln2_b"])          # (B, 1, D) f32
    z = linear_tiled(pooled.reshape(B, D).astype(jnp.bfloat16),
                     p["out_w"], p["out_b"])                      # one (B,D)@(D,E) matmul
    return z.reshape(B, 1, -1)                                    # keepdim=True


def decoder_forward(p, Z, n, nhead):
    B = Z.shape[0]
    D = p["in_w"].shape[1]
    pe = p["pe"][:n]
    zproj = linear_tiled(Z.reshape(B, -1).astype(jnp.bfloat16),
                         p["in_w"], p["in_b"])                    # one (B,E)@(E,D) matmul
    h = broadcast_pe(zproj.reshape(B, 1, D), pe)                  # repeat never materialized
    for lp in p["layers"]:
        h = transformer_layer(h, lp, nhead)
    out = linear_tiled(h.reshape(B * n, D), p["out_w"], p["out_b"])
    return out.reshape(B, n, -1)


def autoencoder_forward(params, X, nhead, return_Z=False):
    # Mirrors Autoencoder.forward with variational=False, eval mode.
    n = X.shape[1]
    Z = encoder_forward(params["encoder"], X, nhead)              # (B, 1, doc_emb)
    out = decoder_forward(params["decoder"], Z, n, nhead)
    if return_Z:
        return out, Z
    return out


# ----------------------------------------------------------------------------
# Deterministic parameter init (synthetic — no checkpoint load)
# ----------------------------------------------------------------------------
def init_params(key, word_emb, doc_emb, d_model, nhead, num_layers, max_log2len):
    ff = 4 * d_model
    keys = iter(jax.random.split(key, 256))

    def dense(fan_in, fan_out):
        w = 0.02 * jax.random.normal(next(keys), (fan_in, fan_out), jnp.float32)
        return w.astype(jnp.bfloat16), jnp.zeros((fan_out,), jnp.float32)

    def layer():
        wqkv, bqkv = dense(d_model, 3 * d_model)                  # fused Q|K|V projection
        wo, bo = dense(d_model, d_model)
        w1, b1 = dense(d_model, ff)
        w2, b2 = dense(ff, d_model)
        return dict(
            wqkv=wqkv, bqkv=bqkv, wo=wo, bo=bo,
            w1=w1, b1=b1, w2=w2, b2=b2,
            ln1_g=jnp.ones((d_model,), jnp.float32),
            ln1_b=jnp.zeros((d_model,), jnp.float32),
            ln2_g=jnp.ones((d_model,), jnp.float32),
            ln2_b=jnp.zeros((d_model,), jnp.float32),
        )

    pe = sinusoidal_pe(2 ** max_log2len, d_model)

    enc_in_w, enc_in_b = dense(word_emb, d_model)
    enc_out_w, enc_out_b = dense(d_model, doc_emb)
    dec_in_w, dec_in_b = dense(doc_emb, d_model)
    dec_out_w, dec_out_b = dense(d_model, word_emb)

    encoder = dict(in_w=enc_in_w, in_b=enc_in_b, out_w=enc_out_w, out_b=enc_out_b,
                   pe=pe, layers=[layer() for _ in range(num_layers)])
    decoder = dict(in_w=dec_in_w, in_b=dec_in_b, out_w=dec_out_w, out_b=dec_out_b,
                   pe=pe, layers=[layer() for _ in range(num_layers)])
    return dict(encoder=encoder, decoder=decoder)


if __name__ == "__main__":
    B, N = 2, 8
    word_embedding_size = 16
    document_embedding_size = 32
    d_model, nhead, num_layers, max_log2len = 32, 4, 2, 8

    # Probe optional features (Buffered(1), head-batched attention) before jit.
    resolve_tpu_caps(seq_len=N, d_model=d_model, nhead=nhead)

    key = jax.random.PRNGKey(0)
    pkey, xkey = jax.random.split(key)
    params = init_params(pkey, word_embedding_size, document_embedding_size,
                         d_model, nhead, num_layers, max_log2len)
    X = jax.random.normal(xkey, (B, N, word_embedding_size), jnp.float32)

    fwd = jax.jit(functools.partial(autoencoder_forward, nhead=nhead))
    out = fwd(params, X)
    jax.block_until_ready(out)
    assert out.shape == (B, N, word_embedding_size), out.shape
    assert bool(jnp.all(jnp.isfinite(out)))
    print("KERNEL_OK")
</pallas_src>

<mosaic_0001>
module attributes {stable_mosaic.version = 11 : i64} {
  func.func @_probe_buf_kernel(%arg0: i32, %arg1: memref<8x128xf32, #tpu.memory_space<vmem>>, %arg2: memref<8x128xf32, #tpu.memory_space<vmem>>) attributes {dimension_semantics = [#tpu.dimension_semantics<arbitrary>], iteration_bounds = array<i64: 2>, scalar_prefetch = 0 : i64, scratch_operands = 0 : i64, tpu.core_type = #tpu.core_type<tc>, window_params = [{pipeline_mode = #tpu.pipeline_mode<synchronous>, transform_indices = @transform_0, window_bounds = array<i64: 8, 128>}, {pipeline_mode = #tpu.pipeline_mode<synchronous>, transform_indices = @transform_1, window_bounds = array<i64: 8, 128>}]} {
    %c0 = arith.constant 0 : index
    %c0_0 = arith.constant 0 : index
    %0 = vector.load %arg1[%c0, %c0_0] : memref<8x128xf32, #tpu.memory_space<vmem>>, vector<8x128xf32>
    %cst = arith.constant 1.000000e+00 : f32
    %1 = vector.broadcast %cst : f32 to vector<8x128xf32>
    %2 = arith.addf %0, %1 : vector<8x128xf32>
    %c0_1 = arith.constant 0 : index
    %c0_2 = arith.constant 0 : index
    %3 = vector.load %arg2[%c0_1, %c0_2] : memref<8x128xf32, #tpu.memory_space<vmem>>, vector<8x128xf32>
    tpu.vector_store %arg2[%c0_1, %c0_2], %2 {strides = array<i32>} : memref<8x128xf32, #tpu.memory_space<vmem>>, vector<8x128xf32>,
    return
  }
  func.func @transform_0(%arg0: i32) -> (i32, i32) {
    %c0_i32 = arith.constant 0 : i32
    %c0_i32_0 = arith.constant 0 : i32
    %c0_i32_1 = arith.constant 0 : i32
    return %c0_i32, %c0_i32_0 : i32, i32
  }
  func.func @transform_1(%arg0: i32) -> (i32, i32) {
    %c0_i32 = arith.constant 0 : i32
    %c0_i32_0 = arith.constant 0 : i32
    %c0_i32_1 = arith.constant 0 : i32
    return %c0_i32, %c0_i32_0 : i32, i32
  }
}

module attributes {stable_mosaic.version = 11 : i64} {
  func.func @_probe_bh_kernel(%arg0: memref<8x32xbf16, #tpu.memory_space<vmem>>, %arg1: memref<8x32xf32, #tpu.memory_space<vmem>>) attributes {dimension_semantics = [], scalar_prefetch = 0 : i64, scratch_operands = 0 : i64, tpu.core_type = #tpu.core_type<tc>} {
    %c0 = arith.constant 0 : index
    %c0_0 = arith.constant 0 : index
    %0 = vector.load %arg0[%c0, %c0_0] : memref<8x32xbf16, #tpu.memory_space<vmem>>, vector<8x32xbf16>
    %1 = vector.shape_cast %0 : vector<8x32xbf16> to vector<8x4x8xbf16>
    %2 = tpu.transpose %1, [1, 0, 2] : vector<8x4x8xbf16> -> vector<4x8x8xbf16>
    "tpu.trace_start"() <{level = 10 : i32, message = "hqd,hkd->hqk"}> : () -> ()
    %cst = arith.constant dense<0.000000e+00> : vector<4x8x8xf32>
    %3 = tpu.matmul %2, %2, %cst {dimension_numbers = #tpu.dot_dimension_numbers<[2], [2], [1], [1], [0, 0, 0, 1, 1, 1], [0], [0]>} : vector<4x8x8xbf16>, vector<4x8x8xbf16>, vector<4x8x8xf32> -> vector<4x8x8xf32>
    "tpu.trace_stop"() : () -> ()
    %4 = arith.truncf %3 : vector<4x8x8xf32> to vector<4x8x8xbf16>
    "tpu.trace_start"() <{level = 10 : i32, message = "hqk,hkd->hqd"}> : () -> ()
    %cst_1 = arith.constant dense<0.000000e+00> : vector<4x8x8xf32>
    %5 = tpu.matmul %4, %2, %cst_1 {dimension_numbers = #tpu.dot_dimension_numbers<[2], [1], [1], [2], [0, 0, 0, 1, 1, 2], [0], [0]>} : vector<4x8x8xbf16>, vector<4x8x8xbf16>, vector<4x8x8xf32> -> vector<4x8x8xf32>
    "tpu.trace_stop"() : () -> ()
    %6 = arith.truncf %5 : vector<4x8x8xf32> to vector<4x8x8xbf16>
    %7 = tpu.transpose %6, [1, 0, 2] : vector<4x8x8xbf16> -> vector<8x4x8xbf16>
    %8 = vector.shape_cast %7 : vector<8x4x8xbf16> to vector<8x32xbf16>
    %9 = arith.extf %8 : vector<8x32xbf16> to vector<8x32xf32>
    %c0_2 = arith.constant 0 : index
    %c0_3 = arith.constant 0 : index
    %10 = vector.load %arg1[%c0_2, %c0_3] : memref<8x32xf32, #tpu.memory_space<vmem>>, vector<8x32xf32>
    tpu.vector_store %arg1[%c0_2, %c0_3], %9 {strides = array<i32>} : memref<8x32xf32, #tpu.memory_space<vmem>>, vector<8x32xf32>,
    return
  }
}

module attributes {stable_mosaic.version = 11 : i64} {
  func.func @_inproj_pe_kernel(%arg0: i32, %arg1: i32, %arg2: memref<1x8x16xbf16, #tpu.memory_space<vmem>>, %arg3: memref<16x32xbf16, #tpu.memory_space<vmem>>, %arg4: memref<1x32xf32, #tpu.memory_space<vmem>>, %arg5: memref<8x32xf32, #tpu.memory_space<vmem>>, %arg6: memref<1x8x32xbf16, #tpu.memory_space<vmem>>) attributes {dimension_semantics = [#tpu.dimension_semantics<parallel>, #tpu.dimension_semantics<parallel>], iteration_bounds = array<i64: 2, 1>, scalar_prefetch = 0 : i64, scratch_operands = 0 : i64, tpu.core_type = #tpu.core_type<tc>, window_params = [{transform_indices = @transform_0, window_bounds = array<i64: 1, 8, 16>}, {pipeline_mode = #tpu.pipeline_mode<synchronous>, transform_indices = @transform_1, window_bounds = array<i64: 16, 32>}, {pipeline_mode = #tpu.pipeline_mode<synchronous>, transform_indices = @transform_2, window_bounds = array<i64: 1, 32>}, {transform_indices = @transform_3, window_bounds = array<i64: 8, 32>}, {transform_indices = @transform_4, window_bounds = array<i64: 1, 8, 32>}]} {
    %c0 = arith.constant 0 : index
    %c0_0 = arith.constant 0 : index
    %c0_1 = arith.constant 0 : index
    %0 = vector.load %arg2[%c0, %c0_0, %c0_1] : memref<1x8x16xbf16, #tpu.memory_space<vmem>>, vector<1x8x16xbf16>
    %1 = vector.shape_cast %0 : vector<1x8x16xbf16> to vector<8x16xbf16>
    %c0_2 = arith.constant 0 : index
    %c0_3 = arith.constant 0 : index
    %2 = vector.load %arg3[%c0_2, %c0_3] : memref<16x32xbf16, #tpu.memory_space<vmem>>, vector<16x32xbf16>
    %cst = arith.constant dense<0.000000e+00> : vector<8x32xf32>
    %3 = tpu.matmul %1, %2, %cst {dimension_numbers = #tpu.dot_dimension_numbers<[1], [0], [0], [1], [0, 0, 1, 1], [], []>} : vector<8x16xbf16>, vector<16x32xbf16>, vector<8x32xf32> -> vector<8x32xf32>
    %c0_4 = arith.constant 0 : index
    %c0_5 = arith.constant 0 : index
    %4 = vector.load %arg4[%c0_4, %c0_5] : memref<1x32xf32, #tpu.memory_space<vmem>>, vector<1x32xf32>
    %5 = vector.broadcast %4 : vector<1x32xf32> to vector<8x32xf32>
    %6 = arith.addf %3, %5 : vector<8x32xf32>
    %c0_6 = arith.constant 0 : index
    %c0_7 = arith.constant 0 : index
    %7 = vector.load %arg5[%c0_6, %c0_7] : memref<8x32xf32, #tpu.memory_space<vmem>>, vector<8x32xf32>
    %8 = arith.addf %6, %7 : vector<8x32xf32>
    %9 = arith.truncf %8 : vector<8x32xf32> to vector<8x32xbf16>
    %c0_8 = arith.constant 0 : index
    %c0_9 = arith.constant 0 : index
    %c0_10 = arith.constant 0 : index
    %10 = vector.load %arg6[%c0_8, %c0_9, %c0_10] : memref<1x8x32xbf16, #tpu.memory_space<vmem>>, vector<1x8x32xbf16>
    %11 = vector.shape_cast %10 : vector<1x8x32xbf16> to vector<8x32xbf16>
    %12 = vector.shape_cast %9 : vector<8x32xbf16> to vector<1x8x32xbf16>
    tpu.vector_store %arg6[%c0_8, %c0_9, %c0_10], %12 {strides = array<i32>} : memref<1x8x32xbf16, #tpu.memory_space<vmem>>, vector<1x8x32xbf16>,
    return
  }
  func.func @transform_0(%arg0: i32, %arg1: i32) -> (i32, i32, i32) {
    %c0_i32 = arith.constant 0 : i32
    %c0_i32_0 = arith.constant 0 : i32
    return %arg0, %arg1, %c0_i32 : i32, i32, i32
  }
  func.func @transform_1(%arg0: i32, %arg1: i32) -> (i32, i32) {
    %c0_i32 = arith.constant 0 : i32
    %c0_i32_0 = arith.constant 0 : i32
    %c0_i32_1 = arith.constant 0 : i32
    return %c0_i32, %c0_i32_0 : i32, i32
  }
  func.func @transform_2(%arg0: i32, %arg1: i32) -> (i32, i32) {
    %c0_i32 = arith.constant 0 : i32
    %c0_i32_0 = arith.constant 0 : i32
    %c0_i32_1 = arith.constant 0 : i32
    return %c0_i32, %c0_i32_0 : i32, i32
  }
  func.func @transform_3(%arg0: i32, %arg1: i32) -> (i32, i32) {
    %c0_i32 = arith.constant 0 : i32
    %c0_i32_0 = arith.constant 0 : i32
    return %arg1, %c0_i32 : i32, i32
  }
  func.func @transform_4(%arg0: i32, %arg1: i32) -> (i32, i32, i32) {
    %c0_i32 = arith.constant 0 : i32
    %c0_i32_0 = arith.constant 0 : i32
    return %arg0, %arg1, %c0_i32 : i32, i32, i32
  }
}

module attributes {stable_mosaic.version = 11 : i64} {
  func.func @_attn_block_kernel(%arg0: i32, %arg1: memref<1x8x32xbf16, #tpu.memory_space<vmem>>, %arg2: memref<32x96xbf16, #tpu.memory_space<vmem>>, %arg3: memref<1x96xf32, #tpu.memory_space<vmem>>, %arg4: memref<32x32xbf16, #tpu.memory_space<vmem>>, %arg5: memref<1x32xf32, #tpu.memory_space<vmem>>, %arg6: memref<1x32xf32, #tpu.memory_space<vmem>>, %arg7: memref<1x32xf32, #tpu.memory_space<vmem>>, %arg8: memref<1x8x32xbf16, #tpu.memory_space<vmem>>) attributes {dimension_semantics = [#tpu.dimension_semantics<parallel>], iteration_bounds = array<i64: 2>, scalar_prefetch = 0 : i64, scratch_operands = 0 : i64, tpu.core_type = #tpu.core_type<tc>, window_params = [{transform_indices = @transform_0, window_bounds = array<i64: 1, 8, 32>}, {pipeline_mode = #tpu.pipeline_mode<synchronous>, transform_indices = @transform_1, window_bounds = array<i64: 32, 96>}, {pipeline_mode = #tpu.pipeline_mode<synchronous>, transform_indices = @transform_2, window_bounds = array<i64: 1, 96>}, {pipeline_mode = #tpu.pipeline_mode<synchronous>, transform_indices = @transform_3, window_bounds = array<i64: 32, 32>}, {pipeline_mode = #tpu.pipeline_mode<synchronous>, transform_indices = @transform_4, window_bounds = array<i64: 1, 32>}, {pipeline_mode = #tpu.pipeline_mode<synchronous>, transform_indices = @transform_5, window_bounds = array<i64: 1, 32>}, {pipeline_mode = #tpu.pipeline_mode<synchronous>, transform_indices = @transform_6, window_bounds = array<i64: 1, 32>}, {transform_indices = @transform_7, window_bounds = array<i64: 1, 8, 32>}]} {
    %c0 = arith.constant 0 : index
    %c0_0 = arith.constant 0 : index
    %c0_1 = arith.constant 0 : index
    %0 = vector.load %arg1[%c0, %c0_0, %c0_1] : memref<1x8x32xbf16, #tpu.memory_space<vmem>>, vector<1x8x32xbf16>
    %1 = vector.shape_cast %0 : vector<1x8x32xbf16> to vector<8x32xbf16>
    %c0_2 = arith.constant 0 : index
    %c0_3 = arith.constant 0 : index
    %2 = vector.load %arg2[%c0_2, %c0_3] : memref<32x96xbf16, #tpu.memory_space<vmem>>, vector<32x96xbf16>
    %cst = arith.constant dense<0.000000e+00> : vector<8x96xf32>
    %3 = tpu.matmul %1, %2, %cst {dimension_numbers = #tpu.dot_dimension_numbers<[1], [0], [0], [1], [0, 0, 1, 1], [], []>} : vector<8x32xbf16>, vector<32x96xbf16>, vector<8x96xf32> -> vector<8x96xf32>
    %c0_4 = arith.constant 0 : index
    %c0_5 = arith.constant 0 : index
    %4 = vector.load %arg3[%c0_4, %c0_5] : memref<1x96xf32, #tpu.memory_space<vmem>>, vector<1x96xf32>
    %5 = vector.broadcast %4 : vector<1x96xf32> to vector<8x96xf32>
    %6 = arith.addf %3, %5 : vector<8x96xf32>
    %7 = vector.extract_strided_slice %6 {offsets = [0, 0], sizes = [8, 32], strides = [1, 1]} : vector<8x96xf32> to vector<8x32xf32>
    %cst_6 = arith.constant 0.353553385 : f32
    %8 = vector.broadcast %cst_6 : f32 to vector<8x32xf32>
    %9 = arith.mulf %7, %8 : vector<8x32xf32>
    %10 = arith.truncf %9 : vector<8x32xf32> to vector<8x32xbf16>
    %11 = vector.extract_strided_slice %6 {offsets = [0, 32], sizes = [8, 32], strides = [1, 1]} : vector<8x96xf32> to vector<8x32xf32>
    %12 = arith.truncf %11 : vector<8x32xf32> to vector<8x32xbf16>
    %13 = vector.extract_strided_slice %6 {offsets = [0, 64], sizes = [8, 32], strides = [1, 1]} : vector<8x96xf32> to vector<8x32xf32>
    %14 = arith.truncf %13 : vector<8x32xf32> to vector<8x32xbf16>
    %15 = vector.extract_strided_slice %10 {offsets = [0, 0], sizes = [8, 8], strides = [1, 1]} : vector<8x32xbf16> to vector<8x8xbf16>
    %16 = vector.extract_strided_slice %12 {offsets = [0, 0], sizes = [8, 8], strides = [1, 1]} : vector<8x32xbf16> to vector<8x8xbf16>
    %cst_7 = arith.constant dense<0.000000e+00> : vector<8x8xf32>
    %17 = tpu.matmul %15, %16, %cst_7 {dimension_numbers = #tpu.dot_dimension_numbers<[1], [1], [0], [0], [0, 0, 1, 0], [], []>} : vector<8x8xbf16>, vector<8x8xbf16>, vector<8x8xf32> -> vector<8x8xf32>
    %cst_8 = arith.constant dense<0xFF800000> : vector<8xf32>
    %18 = vector.multi_reduction <maximumf>, %17, %cst_8 [1] : vector<8x8xf32> to vector<8xf32>
    %19 = vector.shape_cast %18 : vector<8xf32> to vector<8x1xf32>
    %20 = vector.broadcast %19 : vector<8x1xf32> to vector<8x8xf32>
    %21 = arith.subf %17, %20 : vector<8x8xf32>
    %22 = math.exp %21 : vector<8x8xf32>
    %cst_9 = arith.constant dense<0.000000e+00> : vector<8xf32>
    %23 = vector.multi_reduction <add>, %22, %cst_9 [1] : vector<8x8xf32> to vector<8xf32>
    %24 = vector.shape_cast %23 : vector<8xf32> to vector<8x1xf32>
    %25 = tpu.reciprocal %24 {approx = true} : vector<8x1xf32> -> vector<8x1xf32>
    %26 = vector.broadcast %25 : vector<8x1xf32> to vector<8x8xf32>
    %27 = arith.mulf %22, %26 : vector<8x8xf32>
    %28 = arith.truncf %27 : vector<8x8xf32> to vector<8x8xbf16>
    %29 = vector.extract_strided_slice %14 {offsets = [0, 0], sizes = [8, 8], strides = [1, 1]} : vector<8x32xbf16> to vector<8x8xbf16>
    %cst_10 = arith.constant dense<0.000000e+00> : vector<8x8xf32>
    %30 = tpu.matmul %28, %29, %cst_10 {dimension_numbers = #tpu.dot_dimension_numbers<[1], [0], [0], [1], [0, 0, 1, 1], [], []>} : vector<8x8xbf16>, vector<8x8xbf16>, vector<8x8xf32> -> vector<8x8xf32>
    %31 = vector.extract_strided_slice %10 {offsets = [0, 8], sizes = [8, 8], strides = [1, 1]} : vector<8x32xbf16> to vector<8x8xbf16>
    %32 = vector.extract_strided_slice %12 {offsets = [0, 8], sizes = [8, 8], strides = [1, 1]} : vector<8x32xbf16> to vector<8x8xbf16>
    %cst_11 = arith.constant dense<0.000000e+00> : vector<8x8xf32>
    %33 = tpu.matmul %31, %32, %cst_11 {dimension_numbers = #tpu.dot_dimension_numbers<[1], [1], [0], [0], [0, 0, 1, 0], [], []>} : vector<8x8xbf16>, vector<8x8xbf16>, vector<8x8xf32> -> vector<8x8xf32>
    %cst_12 = arith.constant dense<0xFF800000> : vector<8xf32>
    %34 = vector.multi_reduction <maximumf>, %33, %cst_12 [1] : vector<8x8xf32> to vector<8xf32>
    %35 = vector.shape_cast %34 : vector<8xf32> to vector<8x1xf32>
    %36 = vector.broadcast %35 : vector<8x1xf32> to vector<8x8xf32>
    %37 = arith.subf %33, %36 : vector<8x8xf32>
    %38 = math.exp %37 : vector<8x8xf32>
    %cst_13 = arith.constant dense<0.000000e+00> : vector<8xf32>
    %39 = vector.multi_reduction <add>, %38, %cst_13 [1] : vector<8x8xf32> to vector<8xf32>
    %40 = vector.shape_cast %39 : vector<8xf32> to vector<8x1xf32>
    %41 = tpu.reciprocal %40 {approx = true} : vector<8x1xf32> -> vector<8x1xf32>
    %42 = vector.broadcast %41 : vector<8x1xf32> to vector<8x8xf32>
    %43 = arith.mulf %38, %42 : vector<8x8xf32>
    %44 = arith.truncf %43 : vector<8x8xf32> to vector<8x8xbf16>
    %45 = vector.extract_strided_slice %14 {offsets = [0, 8], sizes = [8, 8], strides = [1, 1]} : vector<8x32xbf16> to vector<8x8xbf16>
    %cst_14 = arith.constant dense<0.000000e+00> : vector<8x8xf32>
    %46 = tpu.matmul %44, %45, %cst_14 {dimension_numbers = #tpu.dot_dimension_numbers<[1], [0], [0], [1], [0, 0, 1, 1], [], []>} : vector<8x8xbf16>, vector<8x8xbf16>, vector<8x8xf32> -> vector<8x8xf32>
    %47 = vector.extract_strided_slice %10 {offsets = [0, 16], sizes = [8, 8], strides = [1, 1]} : vector<8x32xbf16> to vector<8x8xbf16>
    %48 = vector.extract_strided_slice %12 {offsets = [0, 16], sizes = [8, 8], strides = [1, 1]} : vector<8x32xbf16> to vector<8x8xbf16>
    %cst_15 = arith.constant dense<0.000000e+00> : vector<8x8xf32>
    %49 = tpu.matmul %47, %48, %cst_15 {dimension_numbers = #tpu.dot_dimension_numbers<[1], [1], [0], [0], [0, 0, 1, 0], [], []>} : vector<8x8xbf16>, vector<8x8xbf16>, vector<8x8xf32> -> vector<8x8xf32>
    %cst_16 = arith.constant dense<0xFF800000> : vector<8xf32>
    %50 = vector.multi_reduction <maximumf>, %49, %cst_16 [1] : vector<8x8xf32> to vector<8xf32>
    %51 = vector.shape_cast %50 : vector<8xf32> to vector<8x1xf32>
    %52 = vector.broadcast %51 : vector<8x1xf32> to vector<8x8xf32>
    %53 = arith.subf %49, %52 : vector<8x8xf32>
    %54 = math.exp %53 : vector<8x8xf32>
    %cst_17 = arith.constant dense<0.000000e+00> : vector<8xf32>
    %55 = vector.multi_reduction <add>, %54, %cst_17 [1] : vector<8x8xf32> to vector<8xf32>
    %56 = vector.shape_cast %55 : vector<8xf32> to vector<8x1xf32>
    %57 = tpu.reciprocal %56 {approx = true} : vector<8x1xf32> -> vector<8x1xf32>
    %58 = vector.broadcast %57 : vector<8x1xf32> to vector<8x8xf32>
    %59 = arith.mulf %54, %58 : vector<8x8xf32>
    %60 = arith.truncf %59 : vector<8x8xf32> to vector<8x8xbf16>
    %61 = vector.extract_strided_slice %14 {offsets = [0, 16], sizes = [8, 8], strides = [1, 1]} : vector<8x32xbf16> to vector<8x8xbf16>
    %cst_18 = arith.constant dense<0.000000e+00> : vector<8x8xf32>
    %62 = tpu.matmul %60, %61, %cst_18 {dimension_numbers = #tpu.dot_dimension_numbers<[1], [0], [0], [1], [0, 0, 1, 1], [], []>} : vector<8x8xbf16>, vector<8x8xbf16>, vector<8x8xf32> -> vector<8x8xf32>
    %63 = vector.extract_strided_slice %10 {offsets = [0, 24], sizes = [8, 8], strides = [1, 1]} : vector<8x32xbf16> to vector<8x8xbf16>
    %64 = vector.extract_strided_slice %12 {offsets = [0, 24], sizes = [8, 8], strides = [1, 1]} : vector<8x32xbf16> to vector<8x8xbf16>
    %cst_19 = arith.constant dense<0.000000e+00> : vector<8x8xf32>
    %65 = tpu.matmul %63, %64, %cst_19 {dimension_numbers = #tpu.dot_dimension_numbers<[1], [1], [0], [0], [0, 0, 1, 0], [], []>} : vector<8x8xbf16>, vector<8x8xbf16>, vector<8x8xf32> -> vector<8x8xf32>
    %cst_20 = arith.constant dense<0xFF800000> : vector<8xf32>
    %66 = vector.multi_reduction <maximumf>, %65, %cst_20 [1] : vector<8x8xf32> to vector<8xf32>
    %67 = vector.shape_cast %66 : vector<8xf32> to vector<8x1xf32>
    %68 = vector.broadcast %67 : vector<8x1xf32> to vector<8x8xf32>
    %69 = arith.subf %65, %68 : vector<8x8xf32>
    %70 = math.exp %69 : vector<8x8xf32>
    %cst_21 = arith.constant dense<0.000000e+00> : vector<8xf32>
    %71 = vector.multi_reduction <add>, %70, %cst_21 [1] : vector<8x8xf32> to vector<8xf32>
    %72 = vector.shape_cast %71 : vector<8xf32> to vector<8x1xf32>
    %73 = tpu.reciprocal %72 {approx = true} : vector<8x1xf32> -> vector<8x1xf32>
    %74 = vector.broadcast %73 : vector<8x1xf32> to vector<8x8xf32>
    %75 = arith.mulf %70, %74 : vector<8x8xf32>
    %76 = arith.truncf %75 : vector<8x8xf32> to vector<8x8xbf16>
    %77 = vector.extract_strided_slice %14 {offsets = [0, 24], sizes = [8, 8], strides = [1, 1]} : vector<8x32xbf16> to vector<8x8xbf16>
    %cst_22 = arith.constant dense<0.000000e+00> : vector<8x8xf32>
    %78 = tpu.matmul %76, %77, %cst_22 {dimension_numbers = #tpu.dot_dimension_numbers<[1], [0], [0], [1], [0, 0, 1, 1], [], []>} : vector<8x8xbf16>, vector<8x8xbf16>, vector<8x8xf32> -> vector<8x8xf32>
    %79 = tpu.concatenate %30, %46, %62, %78 in 1 : vector<8x8xf32>, vector<8x8xf32>, vector<8x8xf32>, vector<8x8xf32> -> vector<8x32xf32>
    %80 = arith.truncf %79 : vector<8x32xf32> to vector<8x32xbf16>
    %c0_23 = arith.constant 0 : index
    %c0_24 = arith.constant 0 : index
    %81 = vector.load %arg4[%c0_23, %c0_24] : memref<32x32xbf16, #tpu.memory_space<vmem>>, vector<32x32xbf16>
    %cst_25 = arith.constant dense<0.000000e+00> : vector<8x32xf32>
    %82 = tpu.matmul %80, %81, %cst_25 {dimension_numbers = #tpu.dot_dimension_numbers<[1], [0], [0], [1], [0, 0, 1, 1], [], []>} : vector<8x32xbf16>, vector<32x32xbf16>, vector<8x32xf32> -> vector<8x32xf32>
    %c0_26 = arith.constant 0 : index
    %c0_27 = arith.constant 0 : index
    %83 = vector.load %arg5[%c0_26, %c0_27] : memref<1x32xf32, #tpu.memory_space<vmem>>, vector<1x32xf32>
    %84 = vector.broadcast %83 : vector<1x32xf32> to vector<8x32xf32>
    %85 = arith.addf %82, %84 : vector<8x32xf32>
    %86 = arith.extf %1 : vector<8x32xbf16> to vector<8x32xf32>
    %87 = arith.addf %85, %86 : vector<8x32xf32>
    %c0_28 = arith.constant 0 : index
    %c0_29 = arith.constant 0 : index
    %88 = vector.load %arg6[%c0_28, %c0_29] : memref<1x32xf32, #tpu.memory_space<vmem>>, vector<1x32xf32>
    %c0_30 = arith.constant 0 : index
    %c0_31 = arith.constant 0 : index
    %89 = vector.load %arg7[%c0_30, %c0_31] : memref<1x32xf32, #tpu.memory_space<vmem>>, vector<1x32xf32>
    %cst_32 = arith.constant dense<0.000000e+00> : vector<8xf32>
    %90 = vector.multi_reduction <add>, %87, %cst_32 [1] : vector<8x32xf32> to vector<8xf32>
    %91 = vector.shape_cast %90 : vector<8xf32> to vector<8x1xf32>
    %cst_33 = arith.constant 3.200000e+01 : f32
    %92 = vector.broadcast %cst_33 : f32 to vector<8x1xf32>
    %93 = arith.divf %91, %92 : vector<8x1xf32>
    %94 = vector.broadcast %93 : vector<8x1xf32> to vector<8x32xf32>
    %95 = arith.subf %87, %94 : vector<8x32xf32>
    %96 = arith.mulf %95, %95 : vector<8x32xf32>
    %cst_34 = arith.constant dense<0.000000e+00> : vector<8xf32>
    %97 = vector.multi_reduction <add>, %96, %cst_34 [1] : vector<8x32xf32> to vector<8xf32>
    %98 = vector.shape_cast %97 : vector<8xf32> to vector<8x1xf32>
    %cst_35 = arith.constant 3.200000e+01 : f32
    %99 = vector.broadcast %cst_35 : f32 to vector<8x1xf32>
    %100 = arith.divf %98, %99 : vector<8x1xf32>
    %101 = vector.broadcast %93 : vector<8x1xf32> to vector<8x32xf32>
    %102 = arith.subf %87, %101 : vector<8x32xf32>
    %cst_36 = arith.constant 9.99999974E-6 : f32
    %103 = vector.broadcast %cst_36 : f32 to vector<8x1xf32>
    %104 = arith.addf %100, %103 : vector<8x1xf32>
    %105 = math.rsqrt %104 : vector<8x1xf32>
    %106 = vector.broadcast %105 : vector<8x1xf32> to vector<8x32xf32>
    %107 = arith.mulf %102, %106 : vector<8x32xf32>
    %108 = vector.broadcast %88 : vector<1x32xf32> to vector<8x32xf32>
    %109 = arith.mulf %107, %108 : vector<8x32xf32>
    %110 = vector.broadcast %89 : vector<1x32xf32> to vector<8x32xf32>
    %111 = arith.addf %109, %110 : vector<8x32xf32>
    %112 = arith.truncf %111 : vector<8x32xf32> to vector<8x32xbf16>
    %c0_37 = arith.constant 0 : index
    %c0_38 = arith.constant 0 : index
    %c0_39 = arith.constant 0 : index
    %113 = vector.load %arg8[%c0_37, %c0_38, %c0_39] : memref<1x8x32xbf16, #tpu.memory_space<vmem>>, vector<1x8x32xbf16>
    %114 = vector.shape_cast %113 : vector<1x8x32xbf16> to vector<8x32xbf16>
    %115 = vector.shape_cast %112 : vector<8x32xbf16> to vector<1x8x32xbf16>
    tpu.vector_store %arg8[%c0_37, %c0_38, %c0_39], %115 {strides = array<i32>} : memref<1x8x32xbf16, #tpu.memory_space<vmem>>, vector<1x8x32xbf16>,
    return
  }
  func.func @transform_0(%arg0: i32) -> (i32, i32, i32) {
    %c0_i32 = arith.constant 0 : i32
    %c0_i32_0 = arith.constant 0 : i32
    %c0_i32_1 = arith.constant 0 : i32
    return %arg0, %c0_i32, %c0_i32_0 : i32, i32, i32
  }
  func.func @transform_1(%arg0: i32) -> (i32, i32) {
    %c0_i32 = arith.constant 0 : i32
    %c0_i32_0 = arith.constant 0 : i32
    %c0_i32_1 = arith.constant 0 : i32
    return %c0_i32, %c0_i32_0 : i32, i32
  }
  func.func @transform_2(%arg0: i32) -> (i32, i32) {
    %c0_i32 = arith.constant 0 : i32
    %c0_i32_0 = arith.constant 0 : i32
    %c0_i32_1 = arith.constant 0 : i32
    return %c0_i32, %c0_i32_0 : i32, i32
  }
  func.func @transform_3(%arg0: i32) -> (i32, i32) {
    %c0_i32 = arith.constant 0 : i32
    %c0_i32_0 = arith.constant 0 : i32
    %c0_i32_1 = arith.constant 0 : i32
    return %c0_i32, %c0_i32_0 : i32, i32
  }
  func.func @transform_4(%arg0: i32) -> (i32, i32) {
    %c0_i32 = arith.constant 0 : i32
    %c0_i32_0 = arith.constant 0 : i32
    %c0_i32_1 = arith.constant 0 : i32
    return %c0_i32, %c0_i32_0 : i32, i32
  }
  func.func @transform_5(%arg0: i32) -> (i32, i32) {
    %c0_i32 = arith.constant 0 : i32
    %c0_i32_0 = arith.constant 0 : i32
    %c0_i32_1 = arith.constant 0 : i32
    return %c0_i32, %c0_i32_0 : i32, i32
  }
  func.func @transform_6(%arg0: i32) -> (i32, i32) {
    %c0_i32 = arith.constant 0 : i32
    %c0_i32_0 = arith.constant 0 : i32
    %c0_i32_1 = arith.constant 0 : i32
    return %c0_i32, %c0_i32_0 : i32, i32
  }
  func.func @transform_7(%arg0: i32) -> (i32, i32, i32) {
    %c0_i32 = arith.constant 0 : i32
    %c0_i32_0 = arith.constant 0 : i32
    %c0_i32_1 = arith.constant 0 : i32
    return %arg0, %c0_i32, %c0_i32_0 : i32, i32, i32
  }
}

module attributes {stable_mosaic.version = 11 : i64} {
  func.func @_ffn_ln_pool_kernel(%arg0: i32, %arg1: i32, %arg2: memref<1x8x32xbf16, #tpu.memory_space<vmem>>, %arg3: memref<32x128xbf16, #tpu.memory_space<vmem>>, %arg4: memref<1x128xf32, #tpu.memory_space<vmem>>, %arg5: memref<128x32xbf16, #tpu.memory_space<vmem>>, %arg6: memref<1x32xf32, #tpu.memory_space<vmem>>, %arg7: memref<1x32xf32, #tpu.memory_space<vmem>>, %arg8: memref<1x32xf32, #tpu.memory_space<vmem>>, %arg9: memref<1x1x32xf32, #tpu.memory_space<vmem>>, %arg10: memref<8x32xf32, #tpu.memory_space<vmem>>) attributes {dimension_semantics = [#tpu.dimension_semantics<parallel>, #tpu.dimension_semantics<arbitrary>], iteration_bounds = array<i64: 2, 1>, scalar_prefetch = 0 : i64, scratch_operands = 1 : i64, tpu.core_type = #tpu.core_type<tc>, window_params = [{transform_indices = @transform_0, window_bounds = array<i64: 1, 8, 32>}, {transform_indices = @transform_1, window_bounds = array<i64: 32, 128>}, {transform_indices = @transform_2, window_bounds = array<i64: 1, 128>}, {transform_indices = @transform_3, window_bounds = array<i64: 128, 32>}, {pipeline_mode = #tpu.pipeline_mode<synchronous>, transform_indices = @transform_4, window_bounds = array<i64: 1, 32>}, {pipeline_mode = #tpu.pipeline_mode<synchronous>, transform_indices = @transform_5, window_bounds = array<i64: 1, 32>}, {pipeline_mode = #tpu.pipeline_mode<synchronous>, transform_indices = @transform_6, window_bounds = array<i64: 1, 32>}, {transform_indices = @transform_7, window_bounds = array<i64: 1, 1, 32>}]} {
    %c0_i32 = arith.constant 0 : i32
    %0 = arith.cmpi eq, %arg1, %c0_i32 : i32
    %1 = arith.extui %0 : i1 to i32
    %c0_i32_0 = arith.constant 0 : i32
    %2 = arith.cmpi ne, %1, %c0_i32_0 : i32
    scf.if %2 {
      %cst_17 = arith.constant 0.000000e+00 : f32
      %21 = vector.broadcast %cst_17 : f32 to vector<8x32xf32>
      %c0_18 = arith.constant 0 : index
      %c0_19 = arith.constant 0 : index
      %22 = vector.load %arg10[%c0_18, %c0_19] : memref<8x32xf32, #tpu.memory_space<vmem>>, vector<8x32xf32>
      tpu.vector_store %arg10[%c0_18, %c0_19], %21 {strides = array<i32>} : memref<8x32xf32, #tpu.memory_space<vmem>>, vector<8x32xf32>,
    } else {
    }
    %c0 = arith.constant 0 : index
    %c0_1 = arith.constant 0 : index
    %c0_2 = arith.constant 0 : index
    %3 = vector.load %arg2[%c0, %c0_1, %c0_2] : memref<1x8x32xbf16, #tpu.memory_space<vmem>>, vector<1x8x32xbf16>
    %4 = vector.shape_cast %3 : vector<1x8x32xbf16> to vector<8x32xbf16>
    %c0_3 = arith.constant 0 : index
    %c0_4 = arith.constant 0 : index
    %5 = vector.load %arg3[%c0_3, %c0_4] : memref<32x128xbf16, #tpu.memory_space<vmem>>, vector<32x128xbf16>
    %cst = arith.constant dense<0.000000e+00> : vector<8x128xf32>
    %6 = tpu.matmul %4, %5, %cst {dimension_numbers = #tpu.dot_dimension_numbers<[1], [0], [0], [1], [0, 0, 1, 1], [], []>} : vector<8x32xbf16>, vector<32x128xbf16>, vector<8x128xf32> -> vector<8x128xf32>
    %c0_5 = arith.constant 0 : index
    %c0_6 = arith.constant 0 : index
    %7 = vector.load %arg4[%c0_5, %c0_6] : memref<1x128xf32, #tpu.memory_space<vmem>>, vector<1x128xf32>
    %8 = vector.broadcast %7 : vector<1x128xf32> to vector<8x128xf32>
    %9 = arith.addf %6, %8 : vector<8x128xf32>
    %cst_7 = arith.constant 0.000000e+00 : f32
    %10 = vector.broadcast %cst_7 : f32 to vector<8x128xf32>
    %11 = arith.maximumf %9, %10 : vector<8x128xf32>
    %c0_8 = arith.constant 0 : index
    %c0_9 = arith.constant 0 : index
    %12 = vector.load %arg10[%c0_8, %c0_9] : memref<8x32xf32, #tpu.memory_space<vmem>>, vector<8x32xf32>
    %13 = arith.truncf %11 : vector<8x128xf32> to vector<8x128xbf16>
    %c0_10 = arith.constant 0 : index
    %c0_11 = arith.constant 0 : index
    %14 = vector.load %arg5[%c0_10, %c0_11] : memref<128x32xbf16, #tpu.memory_space<vmem>>, vector<128x32xbf16>
    %cst_12 = arith.constant dense<0.000000e+00> : vector<8x32xf32>
    %15 = tpu.matmul %13, %14, %cst_12 {dimension_numbers = #tpu.dot_dimension_numbers<[1], [0], [0], [1], [0, 0, 1, 1], [], []>} : vector<8x128xbf16>, vector<128x32xbf16>, vector<8x32xf32> -> vector<8x32xf32>
    %16 = arith.addf %12, %15 : vector<8x32xf32>
    %c0_13 = arith.constant 0 : index
    %c0_14 = arith.constant 0 : index
    %17 = vector.load %arg10[%c0_13, %c0_14] : memref<8x32xf32, #tpu.memory_space<vmem>>, vector<8x32xf32>
    tpu.vector_store %arg10[%c0_13, %c0_14], %16 {strides = array<i32>} : memref<8x32xf32, #tpu.memory_space<vmem>>, vector<8x32xf32>,
    %c0_i32_15 = arith.constant 0 : i32
    %18 = arith.cmpi eq, %arg1, %c0_i32_15 : i32
    %19 = arith.extui %18 : i1 to i32
    %c0_i32_16 = arith.constant 0 : i32
    %20 = arith.cmpi ne, %19, %c0_i32_16 : i32
    scf.if %20 {
      %c0_17 = arith.constant 0 : index
      %c0_18 = arith.constant 0 : index
      %21 = vector.load %arg10[%c0_17, %c0_18] : memref<8x32xf32, #tpu.memory_space<vmem>>, vector<8x32xf32>
      %c0_19 = arith.constant 0 : index
      %c0_20 = arith.constant 0 : index
      %22 = vector.load %arg6[%c0_19, %c0_20] : memref<1x32xf32, #tpu.memory_space<vmem>>, vector<1x32xf32>
      %23 = vector.broadcast %22 : vector<1x32xf32> to vector<8x32xf32>
      %24 = arith.addf %21, %23 : vector<8x32xf32>
      %25 = arith.extf %4 : vector<8x32xbf16> to vector<8x32xf32>
      %26 = arith.addf %24, %25 : vector<8x32xf32>
      %c0_21 = arith.constant 0 : index
      %c0_22 = arith.constant 0 : index
      %27 = vector.load %arg7[%c0_21, %c0_22] : memref<1x32xf32, #tpu.memory_space<vmem>>, vector<1x32xf32>
      %c0_23 = arith.constant 0 : index
      %c0_24 = arith.constant 0 : index
      %28 = vector.load %arg8[%c0_23, %c0_24] : memref<1x32xf32, #tpu.memory_space<vmem>>, vector<1x32xf32>
      %cst_25 = arith.constant dense<0.000000e+00> : vector<8xf32>
      %29 = vector.multi_reduction <add>, %26, %cst_25 [1] : vector<8x32xf32> to vector<8xf32>
      %30 = vector.shape_cast %29 : vector<8xf32> to vector<8x1xf32>
      %cst_26 = arith.constant 3.200000e+01 : f32
      %31 = vector.broadcast %cst_26 : f32 to vector<8x1xf32>
      %32 = arith.divf %30, %31 : vector<8x1xf32>
      %33 = vector.broadcast %32 : vector<8x1xf32> to vector<8x32xf32>
      %34 = arith.subf %26, %33 : vector<8x32xf32>
      %35 = arith.mulf %34, %34 : vector<8x32xf32>
      %cst_27 = arith.constant dense<0.000000e+00> : vector<8xf32>
      %36 = vector.multi_reduction <add>, %35, %cst_27 [1] : vector<8x32xf32> to vector<8xf32>
      %37 = vector.shape_cast %36 : vector<8xf32> to vector<8x1xf32>
      %cst_28 = arith.constant 3.200000e+01 : f32
      %38 = vector.broadcast %cst_28 : f32 to vector<8x1xf32>
      %39 = arith.divf %37, %38 : vector<8x1xf32>
      %40 = vector.broadcast %32 : vector<8x1xf32> to vector<8x32xf32>
      %41 = arith.subf %26, %40 : vector<8x32xf32>
      %cst_29 = arith.constant 9.99999974E-6 : f32
      %42 = vector.broadcast %cst_29 : f32 to vector<8x1xf32>
      %43 = arith.addf %39, %42 : vector<8x1xf32>
      %44 = math.rsqrt %43 : vector<8x1xf32>
      %45 = vector.broadcast %44 : vector<8x1xf32> to vector<8x32xf32>
      %46 = arith.mulf %41, %45 : vector<8x32xf32>
      %47 = vector.broadcast %27 : vector<1x32xf32> to vector<8x32xf32>
      %48 = arith.mulf %46, %47 : vector<8x32xf32>
      %49 = vector.broadcast %28 : vector<1x32xf32> to vector<8x32xf32>
      %50 = arith.addf %48, %49 : vector<8x32xf32>
      %cst_30 = arith.constant dense<0.000000e+00> : vector<32xf32>
      %51 = vector.multi_reduction <add>, %50, %cst_30 [0] : vector<8x32xf32> to vector<32xf32>
      %52 = vector.shape_cast %51 : vector<32xf32> to vector<1x32xf32>
      %cst_31 = arith.constant 1.250000e-01 : f32
      %53 = vector.broadcast %cst_31 : f32 to vector<1x32xf32>
      %54 = arith.mulf %52, %53 : vector<1x32xf32>
      %c0_32 = arith.constant 0 : index
      %c0_33 = arith.constant 0 : index
      %c0_34 = arith.constant 0 : index
      %55 = vector.load %arg9[%c0_32, %c0_33, %c0_34] : memref<1x1x32xf32, #tpu.memory_space<vmem>>, vector<1x1x32xf32>
      %56 = vector.shape_cast %55 : vector<1x1x32xf32> to vector<1x32xf32>
      %57 = vector.shape_cast %54 : vector<1x32xf32> to vector<1x1x32xf32>
      tpu.vector_store %arg9[%c0_32, %c0_33, %c0_34], %57 {strides = array<i32>} : memref<1x1x32xf32, #tpu.memory_space<vmem>>, vector<1x1x32xf32>,
    } else {
    }
    return
  }
  func.func @transform_0(%arg0: i32, %arg1: i32) -> (i32, i32, i32) {
    %c0_i32 = arith.constant 0 : i32
    %c0_i32_0 = arith.constant 0 : i32
    %c0_i32_1 = arith.constant 0 : i32
    return %arg0, %c0_i32, %c0_i32_0 : i32, i32, i32
  }
  func.func @transform_1(%arg0: i32, %arg1: i32) -> (i32, i32) {
    %c0_i32 = arith.constant 0 : i32
    %c0_i32_0 = arith.constant 0 : i32
    return %c0_i32, %arg1 : i32, i32
  }
  func.func @transform_2(%arg0: i32, %arg1: i32) -> (i32, i32) {
    %c0_i32 = arith.constant 0 : i32
    %c0_i32_0 = arith.constant 0 : i32
    return %c0_i32, %arg1 : i32, i32
  }
  func.func @transform_3(%arg0: i32, %arg1: i32) -> (i32, i32) {
    %c0_i32 = arith.constant 0 : i32
    %c0_i32_0 = arith.constant 0 : i32
    return %arg1, %c0_i32 : i32, i32
  }
  func.func @transform_4(%arg0: i32, %arg1: i32) -> (i32, i32) {
    %c0_i32 = arith.constant 0 : i32
    %c0_i32_0 = arith.constant 0 : i32
    %c0_i32_1 = arith.constant 0 : i32
    return %c0_i32, %c0_i32_0 : i32, i32
  }
  func.func @transform_5(%arg0: i32, %arg1: i32) -> (i32, i32) {
    %c0_i32 = arith.constant 0 : i32
    %c0_i32_0 = arith.constant 0 : i32
    %c0_i32_1 = arith.constant 0 : i32
    return %c0_i32, %c0_i32_0 : i32, i32
  }
  func.func @transform_6(%arg0: i32, %arg1: i32) -> (i32, i32) {
    %c0_i32 = arith.constant 0 : i32
    %c0_i32_0 = arith.constant 0 : i32
    %c0_i32_1 = arith.constant 0 : i32
    return %c0_i32, %c0_i32_0 : i32, i32
  }
  func.func @transform_7(%arg0: i32, %arg1: i32) -> (i32, i32, i32) {
    %c0_i32 = arith.constant 0 : i32
    %c0_i32_0 = arith.constant 0 : i32
    %c0_i32_1 = arith.constant 0 : i32
    return %arg0, %c0_i32, %c0_i32_0 : i32, i32, i32
  }
}

module attributes {stable_mosaic.version = 11 : i64} {
  func.func @_ffn_ln_kernel(%arg0: i32, %arg1: i32, %arg2: memref<16x32xbf16, #tpu.memory_space<vmem>>, %arg3: memref<32x128xbf16, #tpu.memory_space<vmem>>, %arg4: memref<1x128xf32, #tpu.memory_space<vmem>>, %arg5: memref<128x32xbf16, #tpu.memory_space<vmem>>, %arg6: memref<1x32xf32, #tpu.memory_space<vmem>>, %arg7: memref<1x32xf32, #tpu.memory_space<vmem>>, %arg8: memref<1x32xf32, #tpu.memory_space<vmem>>, %arg9: memref<16x32xbf16, #tpu.memory_space<vmem>>, %arg10: memref<16x32xf32, #tpu.memory_space<vmem>>) attributes {dimension_semantics = [#tpu.dimension_semantics<parallel>, #tpu.dimension_semantics<arbitrary>], iteration_bounds = array<i64: 1, 1>, scalar_prefetch = 0 : i64, scratch_operands = 1 : i64, tpu.core_type = #tpu.core_type<tc>, window_params = [{transform_indices = @transform_0, window_bounds = array<i64: 16, 32>}, {transform_indices = @transform_1, window_bounds = array<i64: 32, 128>}, {transform_indices = @transform_2, window_bounds = array<i64: 1, 128>}, {transform_indices = @transform_3, window_bounds = array<i64: 128, 32>}, {pipeline_mode = #tpu.pipeline_mode<synchronous>, transform_indices = @transform_4, window_bounds = array<i64: 1, 32>}, {pipeline_mode = #tpu.pipeline_mode<synchronous>, transform_indices = @transform_5, window_bounds = array<i64: 1, 32>}, {pipeline_mode = #tpu.pipeline_mode<synchronous>, transform_indices = @transform_6, window_bounds = array<i64: 1, 32>}, {transform_indices = @transform_7, window_bounds = array<i64: 16, 32>}]} {
    %c0_i32 = arith.constant 0 : i32
    %0 = arith.cmpi eq, %arg1, %c0_i32 : i32
    %1 = arith.extui %0 : i1 to i32
    %c0_i32_0 = arith.constant 0 : i32
    %2 = arith.cmpi ne, %1, %c0_i32_0 : i32
    scf.if %2 {
      %cst_16 = arith.constant 0.000000e+00 : f32
      %20 = vector.broadcast %cst_16 : f32 to vector<16x32xf32>
      %c0_17 = arith.constant 0 : index
      %c0_18 = arith.constant 0 : index
      %21 = vector.load %arg10[%c0_17, %c0_18] : memref<16x32xf32, #tpu.memory_space<vmem>>, vector<16x32xf32>
      tpu.vector_store %arg10[%c0_17, %c0_18], %20 {strides = array<i32>} : memref<16x32xf32, #tpu.memory_space<vmem>>, vector<16x32xf32>,
    } else {
    }
    %c0 = arith.constant 0 : index
    %c0_1 = arith.constant 0 : index
    %3 = vector.load %arg2[%c0, %c0_1] : memref<16x32xbf16, #tpu.memory_space<vmem>>, vector<16x32xbf16>
    %c0_2 = arith.constant 0 : index
    %c0_3 = arith.constant 0 : index
    %4 = vector.load %arg3[%c0_2, %c0_3] : memref<32x128xbf16, #tpu.memory_space<vmem>>, vector<32x128xbf16>
    %cst = arith.constant dense<0.000000e+00> : vector<16x128xf32>
    %5 = tpu.matmul %3, %4, %cst {dimension_numbers = #tpu.dot_dimension_numbers<[1], [0], [0], [1], [0, 0, 1, 1], [], []>} : vector<16x32xbf16>, vector<32x128xbf16>, vector<16x128xf32> -> vector<16x128xf32>
    %c0_4 = arith.constant 0 : index
    %c0_5 = arith.constant 0 : index
    %6 = vector.load %arg4[%c0_4, %c0_5] : memref<1x128xf32, #tpu.memory_space<vmem>>, vector<1x128xf32>
    %7 = vector.broadcast %6 : vector<1x128xf32> to vector<16x128xf32>
    %8 = arith.addf %5, %7 : vector<16x128xf32>
    %cst_6 = arith.constant 0.000000e+00 : f32
    %9 = vector.broadcast %cst_6 : f32 to vector<16x128xf32>
    %10 = arith.maximumf %8, %9 : vector<16x128xf32>
    %c0_7 = arith.constant 0 : index
    %c0_8 = arith.constant 0 : index
    %11 = vector.load %arg10[%c0_7, %c0_8] : memref<16x32xf32, #tpu.memory_space<vmem>>, vector<16x32xf32>
    %12 = arith.truncf %10 : vector<16x128xf32> to vector<16x128xbf16>
    %c0_9 = arith.constant 0 : index
    %c0_10 = arith.constant 0 : index
    %13 = vector.load %arg5[%c0_9, %c0_10] : memref<128x32xbf16, #tpu.memory_space<vmem>>, vector<128x32xbf16>
    %cst_11 = arith.constant dense<0.000000e+00> : vector<16x32xf32>
    %14 = tpu.matmul %12, %13, %cst_11 {dimension_numbers = #tpu.dot_dimension_numbers<[1], [0], [0], [1], [0, 0, 1, 1], [], []>} : vector<16x128xbf16>, vector<128x32xbf16>, vector<16x32xf32> -> vector<16x32xf32>
    %15 = arith.addf %11, %14 : vector<16x32xf32>
    %c0_12 = arith.constant 0 : index
    %c0_13 = arith.constant 0 : index
    %16 = vector.load %arg10[%c0_12, %c0_13] : memref<16x32xf32, #tpu.memory_space<vmem>>, vector<16x32xf32>
    tpu.vector_store %arg10[%c0_12, %c0_13], %15 {strides = array<i32>} : memref<16x32xf32, #tpu.memory_space<vmem>>, vector<16x32xf32>,
    %c0_i32_14 = arith.constant 0 : i32
    %17 = arith.cmpi eq, %arg1, %c0_i32_14 : i32
    %18 = arith.extui %17 : i1 to i32
    %c0_i32_15 = arith.constant 0 : i32
    %19 = arith.cmpi ne, %18, %c0_i32_15 : i32
    scf.if %19 {
      %c0_16 = arith.constant 0 : index
      %c0_17 = arith.constant 0 : index
      %20 = vector.load %arg10[%c0_16, %c0_17] : memref<16x32xf32, #tpu.memory_space<vmem>>, vector<16x32xf32>
      %c0_18 = arith.constant 0 : index
      %c0_19 = arith.constant 0 : index
      %21 = vector.load %arg6[%c0_18, %c0_19] : memref<1x32xf32, #tpu.memory_space<vmem>>, vector<1x32xf32>
      %22 = vector.broadcast %21 : vector<1x32xf32> to vector<16x32xf32>
      %23 = arith.addf %20, %22 : vector<16x32xf32>
      %24 = arith.extf %3 : vector<16x32xbf16> to vector<16x32xf32>
      %25 = arith.addf %23, %24 : vector<16x32xf32>
      %c0_20 = arith.constant 0 : index
      %c0_21 = arith.constant 0 : index
      %26 = vector.load %arg7[%c0_20, %c0_21] : memref<1x32xf32, #tpu.memory_space<vmem>>, vector<1x32xf32>
      %c0_22 = arith.constant 0 : index
      %c0_23 = arith.constant 0 : index
      %27 = vector.load %arg8[%c0_22, %c0_23] : memref<1x32xf32, #tpu.memory_space<vmem>>, vector<1x32xf32>
      %cst_24 = arith.constant dense<0.000000e+00> : vector<16xf32>
      %28 = vector.multi_reduction <add>, %25, %cst_24 [1] : vector<16x32xf32> to vector<16xf32>
      %29 = vector.shape_cast %28 : vector<16xf32> to vector<16x1xf32>
      %cst_25 = arith.constant 3.200000e+01 : f32
      %30 = vector.broadcast %cst_25 : f32 to vector<16x1xf32>
      %31 = arith.divf %29, %30 : vector<16x1xf32>
      %32 = vector.broadcast %31 : vector<16x1xf32> to vector<16x32xf32>
      %33 = arith.subf %25, %32 : vector<16x32xf32>
      %34 = arith.mulf %33, %33 : vector<16x32xf32>
      %cst_26 = arith.constant dense<0.000000e+00> : vector<16xf32>
      %35 = vector.multi_reduction <add>, %34, %cst_26 [1] : vector<16x32xf32> to vector<16xf32>
      %36 = vector.shape_cast %35 : vector<16xf32> to vector<16x1xf32>
      %cst_27 = arith.constant 3.200000e+01 : f32
      %37 = vector.broadcast %cst_27 : f32 to vector<16x1xf32>
      %38 = arith.divf %36, %37 : vector<16x1xf32>
      %39 = vector.broadcast %31 : vector<16x1xf32> to vector<16x32xf32>
      %40 = arith.subf %25, %39 : vector<16x32xf32>
      %cst_28 = arith.constant 9.99999974E-6 : f32
      %41 = vector.broadcast %cst_28 : f32 to vector<16x1xf32>
      %42 = arith.addf %38, %41 : vector<16x1xf32>
      %43 = math.rsqrt %42 : vector<16x1xf32>
      %44 = vector.broadcast %43 : vector<16x1xf32> to vector<16x32xf32>
      %45 = arith.mulf %40, %44 : vector<16x32xf32>
      %46 = vector.broadcast %26 : vector<1x32xf32> to vector<16x32xf32>
      %47 = arith.mulf %45, %46 : vector<16x32xf32>
      %48 = vector.broadcast %27 : vector<1x32xf32> to vector<16x32xf32>
      %49 = arith.addf %47, %48 : vector<16x32xf32>
      %50 = arith.truncf %49 : vector<16x32xf32> to vector<16x32xbf16>
      %c0_29 = arith.constant 0 : index
      %c0_30 = arith.constant 0 : index
      %51 = vector.load %arg9[%c0_29, %c0_30] : memref<16x32xbf16, #tpu.memory_space<vmem>>, vector<16x32xbf16>
      tpu.vector_store %arg9[%c0_29, %c0_30], %50 {strides = array<i32>} : memref<16x32xbf16, #tpu.memory_space<vmem>>, vector<16x32xbf16>,
    } else {
    }
    return
  }
  func.func @transform_0(%arg0: i32, %arg1: i32) -> (i32, i32) {
    %c0_i32 = arith.constant 0 : i32
    %c0_i32_0 = arith.constant 0 : i32
    return %arg0, %c0_i32 : i32, i32
  }
  func.func @transform_1(%arg0: i32, %arg1: i32) -> (i32, i32) {
    %c0_i32 = arith.constant 0 : i32
    %c0_i32_0 = arith.constant 0 : i32
    return %c0_i32, %arg1 : i32, i32
  }
  func.func @transform_2(%arg0: i32, %arg1: i32) -> (i32, i32) {
    %c0_i32 = arith.constant 0 : i32
    %c0_i32_0 = arith.constant 0 : i32
    return %c0_i32, %arg1 : i32, i32
  }
  func.func @transform_3(%arg0: i32, %arg1: i32) -> (i32, i32) {
    %c0_i32 = arith.constant 0 : i32
    %c0_i32_0 = arith.constant 0 : i32
    return %arg1, %c0_i32 : i32, i32
  }
  func.func @transform_4(%arg0: i32, %arg1: i32) -> (i32, i32) {
    %c0_i32 = arith.constant 0 : i32
    %c0_i32_0 = arith.constant 0 : i32
    %c0_i32_1 = arith.constant 0 : i32
    return %c0_i32, %c0_i32_0 : i32, i32
  }
  func.func @transform_5(%arg0: i32, %arg1: i32) -> (i32, i32) {
    %c0_i32 = arith.constant 0 : i32
    %c0_i32_0 = arith.constant 0 : i32
    %c0_i32_1 = arith.constant 0 : i32
    return %c0_i32, %c0_i32_0 : i32, i32
  }
  func.func @transform_6(%arg0: i32, %arg1: i32) -> (i32, i32) {
    %c0_i32 = arith.constant 0 : i32
    %c0_i32_0 = arith.constant 0 : i32
    %c0_i32_1 = arith.constant 0 : i32
    return %c0_i32, %c0_i32_0 : i32, i32
  }
  func.func @transform_7(%arg0: i32, %arg1: i32) -> (i32, i32) {
    %c0_i32 = arith.constant 0 : i32
    %c0_i32_0 = arith.constant 0 : i32
    return %arg0, %c0_i32 : i32, i32
  }
}

module attributes {stable_mosaic.version = 11 : i64} {
  func.func @_linear_kernel(%arg0: i32, %arg1: memref<2x32xbf16, #tpu.memory_space<vmem>>, %arg2: memref<32x32xbf16, #tpu.memory_space<vmem>>, %arg3: memref<1x32xf32, #tpu.memory_space<vmem>>, %arg4: memref<2x32xf32, #tpu.memory_space<vmem>>) attributes {dimension_semantics = [#tpu.dimension_semantics<parallel>], iteration_bounds = array<i64: 1>, scalar_prefetch = 0 : i64, scratch_operands = 0 : i64, tpu.core_type = #tpu.core_type<tc>, window_params = [{transform_indices = @transform_0, window_bounds = array<i64: 2, 32>}, {pipeline_mode = #tpu.pipeline_mode<synchronous>, transform_indices = @transform_1, window_bounds = array<i64: 32, 32>}, {pipeline_mode = #tpu.pipeline_mode<synchronous>, transform_indices = @transform_2, window_bounds = array<i64: 1, 32>}, {transform_indices = @transform_3, window_bounds = array<i64: 2, 32>}]} {
    %c0 = arith.constant 0 : index
    %c0_0 = arith.constant 0 : index
    %0 = vector.load %arg1[%c0, %c0_0] : memref<2x32xbf16, #tpu.memory_space<vmem>>, vector<2x32xbf16>
    %c0_1 = arith.constant 0 : index
    %c0_2 = arith.constant 0 : index
    %1 = vector.load %arg2[%c0_1, %c0_2] : memref<32x32xbf16, #tpu.memory_space<vmem>>, vector<32x32xbf16>
    %cst = arith.constant dense<0.000000e+00> : vector<2x32xf32>
    %2 = tpu.matmul %0, %1, %cst {dimension_numbers = #tpu.dot_dimension_numbers<[1], [0], [0], [1], [0, 0, 1, 1], [], []>} : vector<2x32xbf16>, vector<32x32xbf16>, vector<2x32xf32> -> vector<2x32xf32>
    %c0_3 = arith.constant 0 : index
    %c0_4 = arith.constant 0 : index
    %3 = vector.load %arg3[%c0_3, %c0_4] : memref<1x32xf32, #tpu.memory_space<vmem>>, vector<1x32xf32>
    %4 = vector.broadcast %3 : vector<1x32xf32> to vector<2x32xf32>
    %5 = arith.addf %2, %4 : vector<2x32xf32>
    %c0_5 = arith.constant 0 : index
    %c0_6 = arith.constant 0 : index
    %6 = vector.load %arg4[%c0_5, %c0_6] : memref<2x32xf32, #tpu.memory_space<vmem>>, vector<2x32xf32>
    tpu.vector_store %arg4[%c0_5, %c0_6], %5 {strides = array<i32>} : memref<2x32xf32, #tpu.memory_space<vmem>>, vector<2x32xf32>,
    return
  }
  func.func @transform_0(%arg0: i32) -> (i32, i32) {
    %c0_i32 = arith.constant 0 : i32
    %c0_i32_0 = arith.constant 0 : i32
    return %arg0, %c0_i32 : i32, i32
  }
  func.func @transform_1(%arg0: i32) -> (i32, i32) {
    %c0_i32 = arith.constant 0 : i32
    %c0_i32_0 = arith.constant 0 : i32
    %c0_i32_1 = arith.constant 0 : i32
    return %c0_i32, %c0_i32_0 : i32, i32
  }
  func.func @transform_2(%arg0: i32) -> (i32, i32) {
    %c0_i32 = arith.constant 0 : i32
    %c0_i32_0 = arith.constant 0 : i32
    %c0_i32_1 = arith.constant 0 : i32
    return %c0_i32, %c0_i32_0 : i32, i32
  }
  func.func @transform_3(%arg0: i32) -> (i32, i32) {
    %c0_i32 = arith.constant 0 : i32
    %c0_i32_0 = arith.constant 0 : i32
    return %arg0, %c0_i32 : i32, i32
  }
}

module attributes {stable_mosaic.version = 11 : i64} {
  func.func @_broadcast_pe_kernel(%arg0: i32, %arg1: i32, %arg2: memref<1x1x32xf32, #tpu.memory_space<vmem>>, %arg3: memref<8x32xf32, #tpu.memory_space<vmem>>, %arg4: memref<1x8x32xbf16, #tpu.memory_space<vmem>>) attributes {dimension_semantics = [#tpu.dimension_semantics<parallel>, #tpu.dimension_semantics<parallel>], iteration_bounds = array<i64: 2, 1>, scalar_prefetch = 0 : i64, scratch_operands = 0 : i64, tpu.core_type = #tpu.core_type<tc>, window_params = [{transform_indices = @transform_0, window_bounds = array<i64: 1, 1, 32>}, {transform_indices = @transform_1, window_bounds = array<i64: 8, 32>}, {transform_indices = @transform_2, window_bounds = array<i64: 1, 8, 32>}]} {
    %c0 = arith.constant 0 : index
    %c0_0 = arith.constant 0 : index
    %c0_1 = arith.constant 0 : index
    %0 = vector.load %arg2[%c0, %c0_0, %c0_1] : memref<1x1x32xf32, #tpu.memory_space<vmem>>, vector<1x1x32xf32>
    %1 = vector.shape_cast %0 : vector<1x1x32xf32> to vector<1x32xf32>
    %c0_2 = arith.constant 0 : index
    %c0_3 = arith.constant 0 : index
    %2 = vector.load %arg3[%c0_2, %c0_3] : memref<8x32xf32, #tpu.memory_space<vmem>>, vector<8x32xf32>
    %3 = vector.broadcast %1 : vector<1x32xf32> to vector<8x32xf32>
    %4 = arith.addf %3, %2 : vector<8x32xf32>
    %5 = arith.truncf %4 : vector<8x32xf32> to vector<8x32xbf16>
    %c0_4 = arith.constant 0 : index
    %c0_5 = arith.constant 0 : index
    %c0_6 = arith.constant 0 : index
    %6 = vector.load %arg4[%c0_4, %c0_5, %c0_6] : memref<1x8x32xbf16, #tpu.memory_space<vmem>>, vector<1x8x32xbf16>
    %7 = vector.shape_cast %6 : vector<1x8x32xbf16> to vector<8x32xbf16>
    %8 = vector.shape_cast %5 : vector<8x32xbf16> to vector<1x8x32xbf16>
    tpu.vector_store %arg4[%c0_4, %c0_5, %c0_6], %8 {strides = array<i32>} : memref<1x8x32xbf16, #tpu.memory_space<vmem>>, vector<1x8x32xbf16>,
    return
  }
  func.func @transform_0(%arg0: i32, %arg1: i32) -> (i32, i32, i32) {
    %c0_i32 = arith.constant 0 : i32
    %c0_i32_0 = arith.constant 0 : i32
    %c0_i32_1 = arith.constant 0 : i32
    return %arg0, %c0_i32, %c0_i32_0 : i32, i32, i32
  }
  func.func @transform_1(%arg0: i32, %arg1: i32) -> (i32, i32) {
    %c0_i32 = arith.constant 0 : i32
    %c0_i32_0 = arith.constant 0 : i32
    return %arg1, %c0_i32 : i32, i32
  }
  func.func @transform_2(%arg0: i32, %arg1: i32) -> (i32, i32, i32) {
    %c0_i32 = arith.constant 0 : i32
    %c0_i32_0 = arith.constant 0 : i32
    return %arg0, %arg1, %c0_i32 : i32, i32, i32
  }
}

module attributes {stable_mosaic.version = 11 : i64} {
  func.func @_linear_kernel(%arg0: i32, %arg1: memref<16x32xbf16, #tpu.memory_space<vmem>>, %arg2: memref<32x16xbf16, #tpu.memory_space<vmem>>, %arg3: memref<1x16xf32, #tpu.memory_space<vmem>>, %arg4: memref<16x16xf32, #tpu.memory_space<vmem>>) attributes {dimension_semantics = [#tpu.dimension_semantics<parallel>], iteration_bounds = array<i64: 1>, scalar_prefetch = 0 : i64, scratch_operands = 0 : i64, tpu.core_type = #tpu.core_type<tc>, window_params = [{transform_indices = @transform_0, window_bounds = array<i64: 16, 32>}, {pipeline_mode = #tpu.pipeline_mode<synchronous>, transform_indices = @transform_1, window_bounds = array<i64: 32, 16>}, {pipeline_mode = #tpu.pipeline_mode<synchronous>, transform_indices = @transform_2, window_bounds = array<i64: 1, 16>}, {transform_indices = @transform_3, window_bounds = array<i64: 16, 16>}]} {
    %c0 = arith.constant 0 : index
    %c0_0 = arith.constant 0 : index
    %0 = vector.load %arg1[%c0, %c0_0] : memref<16x32xbf16, #tpu.memory_space<vmem>>, vector<16x32xbf16>
    %c0_1 = arith.constant 0 : index
    %c0_2 = arith.constant 0 : index
    %1 = vector.load %arg2[%c0_1, %c0_2] : memref<32x16xbf16, #tpu.memory_space<vmem>>, vector<32x16xbf16>
    %cst = arith.constant dense<0.000000e+00> : vector<16x16xf32>
    %2 = tpu.matmul %0, %1, %cst {dimension_numbers = #tpu.dot_dimension_numbers<[1], [0], [0], [1], [0, 0, 1, 1], [], []>} : vector<16x32xbf16>, vector<32x16xbf16>, vector<16x16xf32> -> vector<16x16xf32>
    %c0_3 = arith.constant 0 : index
    %c0_4 = arith.constant 0 : index
    %3 = vector.load %arg3[%c0_3, %c0_4] : memref<1x16xf32, #tpu.memory_space<vmem>>, vector<1x16xf32>
    %4 = vector.broadcast %3 : vector<1x16xf32> to vector<16x16xf32>
    %5 = arith.addf %2, %4 : vector<16x16xf32>
    %c0_5 = arith.constant 0 : index
    %c0_6 = arith.constant 0 : index
    %6 = vector.load %arg4[%c0_5, %c0_6] : memref<16x16xf32, #tpu.memory_space<vmem>>, vector<16x16xf32>
    tpu.vector_store %arg4[%c0_5, %c0_6], %5 {strides = array<i32>} : memref<16x16xf32, #tpu.memory_space<vmem>>, vector<16x16xf32>,
    return
  }
  func.func @transform_0(%arg0: i32) -> (i32, i32) {
    %c0_i32 = arith.constant 0 : i32
    %c0_i32_0 = arith.constant 0 : i32
    return %arg0, %c0_i32 : i32, i32
  }
  func.func @transform_1(%arg0: i32) -> (i32, i32) {
    %c0_i32 = arith.constant 0 : i32
    %c0_i32_0 = arith.constant 0 : i32
    %c0_i32_1 = arith.constant 0 : i32
    return %c0_i32, %c0_i32_0 : i32, i32
  }
  func.func @transform_2(%arg0: i32) -> (i32, i32) {
    %c0_i32 = arith.constant 0 : i32
    %c0_i32_0 = arith.constant 0 : i32
    %c0_i32_1 = arith.constant 0 : i32
    return %c0_i32, %c0_i32_0 : i32, i32
  }
  func.func @transform_3(%arg0: i32) -> (i32, i32) {
    %c0_i32 = arith.constant 0 : i32
    %c0_i32_0 = arith.constant 0 : i32
    return %arg0, %c0_i32 : i32, i32
  }
}

</mosaic_0001>

<bundles_post_ra>
// kernel: tpu_custom_call.1
= control target key start
LH: loop header
LB: loop body
LE: loop exit
PB: predicated region body
PF: predicated region fallthrough
CT: control target
= control target key end

     0   :  { %6 = vsyncpa [#allocation3], 0  ;;  %s287_s0 = inlined_call_operand.hbm [shape: f32[8,128], index: 0, kind: input, shape index: {}]   ;;  %s288_s1 = inlined_call_operand.hbm [shape: f32[8,128], index: 1, kind: output, shape index: {}]  }
   0x1   :  { %7 = vsyncpa [#allocation4], 0  ;;  %s270_s6 = smov 0  }
   0x2 LB: > { %s149_s7 = sadd.s32 4294967295, %s256_s6   ;;  %p150_p0 = scmp.ge.s32.totalorder %s256_s6, 1  ;;  %s256_s6 = sphi %s270_s6, %s13_s6  }
   0x3   : > { %p60_p1 = scmp.lt.s32.totalorder %s256_s6, 3  ;;  %s72_s10 = sshll.u32 %s287_s0, 4  ;;  %s73_s10 = int_to_ptr.hbm [resolvable:$true] %s72_s10 }
   0x4   : > { %p170_p3 = scmp.eq.s32.totalorder %s149_s7, 0  ;;  %s258_s11 = smov [#allocation2]  }
   0x5   : > { %p61_p2 = pnand %p150_p0, %p60_p1  ;;  %s74_s12 = sshll.u32 %s258_s11, 4  ;;  %s75_s12 = int_to_ptr.vmem [resolvable:$true] %s74_s12 }
   0x7   : > { %p166_p4 = pneg %p61_p2  ;;  %87 = sbr.rel (%p61_p2) target bundleno = 20 (0x14), region = 24 }
   0x9   : > { %p167_p5 = pnand %p170_p3, %p166_p4 }
   0xb   : > { %169 = dma.hbm_to_vmem [thread:$0]  (!%p167_p5), %s73_s10, 128, %s75_s12, [#allocation3]  }
   0xc   : > { %247 = dma.done.wait (%p170_p3), [#allocation3], 128  }
   0xd   : > { %249 = vsyncadd (%p170_p3), [#allocation3], 4294967168  ;;  %s259_s13 = smov [#allocation5]   ;;  %s109_s17 = sshll.u32 %s288_s1, 4  ;;  %v98_v0 = vld [vmem:[#allocation2] sm:$0xff]  ;;  %s110_s17 = int_to_ptr.hbm [resolvable:$true] %s109_s17 }
   0xe   : > { %s107_s14 = sshll.u32 %s259_s13, 4  ;;  %p172_p6 = scmp.eq.s32.totalorder %s149_s7, 1  ;;  %v99_v1 = vadd.f32 1.0, %v98_v0  ;;  %s108_s14 = int_to_ptr.vmem [resolvable:$true] %s107_s14 }
  0x10   : > { %100 = vst [vmem:[#allocation5] sm:$0xff] %v99_v1 }
  0x11   : > { %163 = dma.vmem_to_hbm [thread:$0]  (%p172_p6), %s108_s14, 128, %s110_s17, [#allocation4]  }
  0x12   : > { %251 = dma.done.wait (%p172_p6), [#allocation4], 128  }
  0x13   : > { %253 = vsyncadd (%p172_p6), [#allocation4], 4294967168 }
  0x14 PF: > { %s13_s6 = sadd.s32 1, %s256_s6  }
  0x15   : > { %p10_p7 = scmp.ge.s32.totalorder %s13_s6, 4  }
  0x17   :  { %12 = sbr.rel (!%p10_p7) target bundleno = 2 (0x2), region = 53 }
  0x1c   :  { %123 = vsyncpa [#allocation3], 1 }
  0x1d   :  { %125 = vsyncpa [#allocation3 + $0x1], 1 }
  0x1e   :  { %126 = vsyncpa [#allocation4], 1 }
  0x1f   :  { %128 = vsyncpa [#allocation4 + $0x1], 1 }

// kernel: tpu_custom_call.1
= control target key start
LH: loop header
LB: loop body
LE: loop exit
PB: predicated region body
PF: predicated region fallthrough
CT: control target
= control target key end

     0   :  { %6 = vsyncpa [#allocation3], 0  ;;  %s626_s0 = inlined_call_operand.hbm [shape: bf16[8,32], index: 0, kind: input, shape index: {}]   ;;  %s627_s1 = inlined_call_operand.hbm [shape: f32[8,32], index: 1, kind: output, shape index: {}]  }
   0x1   :  { %7 = vsyncpa [#allocation4], 0  ;;  %s13_s8 = sshll.u32 %s626_s0, 4  ;;  %s519_s9 = smov [#allocation2]   ;;  %s14_s8 = int_to_ptr.hbm [resolvable:$true] %s13_s8 }
   0x2   :  { %s15_s10 = sshll.u32 %s519_s9, 4  ;;  %s16_s10 = int_to_ptr.vmem [resolvable:$true] %s15_s10 }
   0x3   :  { %18 = dma.hbm_to_vmem [thread:$0]  %s14_s8, 64, %s16_s10, [#allocation3]  }
   0x4   :  { %515 = dma.done.wait [#allocation3], 64  }
   0x5   :  { %516 = vsyncadd [#allocation3], 4294967232  ;;  %v24_v0 = vld [vmem:[#allocation2] sm:$0xf]  ;;  %s520_s11 = smov 120   ;;  %s521_s12 = smov 104  }
   0x6   :  { %26 = vrot.lane.b32.xlu0 %v24_v0, %s520_s11  ;;  %30 = vrot.lane.b32.xlu1 %v24_v0, %s521_s12  ;;  %s522_s13 = smov 112   ;;  %v523_v1 = vmov 1983009808   ;;  %v35_v4 = vshrl.u32 %v24_v0, 16  ;;  %v524_v10 = vmov 1934713408  }
   0x7   :  { %v46_v2 = vunpack.c.l.s4 %v523_v1  ;;  %v60_v11 = vunpack.c.l.s4 %v524_v10  ;;  %vm55_vm0 = vcmask 1047556   ;;  %vm147_vm1 = vcmask 64512   ;;  %s525_s0 = smov 8   ;;  %s526_s14 = smov 16  }
   0x8   :  { %vm219_vm2 = vcmask 1043456   ;;  %s527_s15 = smov 24   ;;  %vm422_vm3 = vcmask 130048   ;;  %vm425_vm4 = vcmask 195584   ;;  %s528_s16 = smov [#allocation5]   ;;  %vm430_vm5 = vcmask 261120  }
   0x9   :  { %v542_v6 = vunpack.c.0.s8 %v46_v2  ;;  %v546_v18 = vunpack.c.0.s8 %v60_v11  ;;  %s437_s17 = sshll.u32 %s528_s16, 4  ;;  %s439_s20 = sshll.u32 %s627_s1, 4  ;;  %s438_s17 = int_to_ptr.vmem [resolvable:$true] %s437_s17  ;;  %s440_s20 = int_to_ptr.hbm [resolvable:$true] %s439_s20 }
   0xe   :  { %28 = vrot.lane.b32.xlu0 %v24_v0, %s522_s13 }
  0x78   :  { %v27_v3 = vpop.permute.xlu0 %26  ;;  %v31_v8 = vpop.permute.xlu1 %30 }
  0x79   :  { %v36_v5 = vshrl.u32 %v27_v3, 16  ;;  %v34_v7 = vpack.i.b16 %v27_v3, %v24_v0  ;;  %v42_v13 = vshrl.u32 %v31_v8, 16 }
  0x7b   :  { %v37_v9 = vpack.i.b16 %v36_v5, %v35_v4  ;;  %v48_v12 = vperm.slane %v34_v7, %v542_v6 }
  0x7d   :  { %v75_v15 = vperm.slane %v37_v9, %v542_v6  ;;  %v57_v19 = vrot.slane %v48_v12, 4 }
  0x7f   :  { %v83_v22 = vrot.slane %v75_v15, 4 }
  0x80   :  { %v29_v14 = vpop.permute.xlu0 %28 }
  0x81   :  { %v40_v16 = vpack.i.b16 %v31_v8, %v29_v14  ;;  %v41_v17 = vshrl.u32 %v29_v14, 16 }
  0x83   :  { %v43_v20 = vpack.i.b16 %v42_v13, %v41_v17  ;;  %v53_v21 = vperm.slane %v40_v16, %v542_v6 }
  0x85   :  { %v54_v23 = vrot.slane %v53_v21, 4  ;;  %v58_v24 = vsel %vm55_vm0, %v53_v21, %v57_v19  ;;  %v80_v25 = vperm.slane %v43_v20, %v542_v6 }
  0x86   :  { %v66_v26 = vperm.slane %v58_v24, %v546_v18 }
  0x87   :  { %v56_v27 = vsel %vm55_vm0, %v54_v23, %v48_v12  ;;  %v81_v28 = vrot.slane %v80_v25, 4  ;;  %v84_v29 = vsel %vm55_vm0, %v80_v25, %v83_v22 }
  0x88   :  { %v62_v30 = vperm.slane %v56_v27, %v546_v18  ;;  %v69_v31 = vrot.slane %v66_v26, 4  ;;  %v92_v32 = vperm.slane %v84_v29, %v546_v18 }
  0x89   :  { %v82_v33 = vsel %vm55_vm0, %v81_v28, %v75_v15 }
  0x8a   :  { %v67_v34 = vrot.slane %v62_v30, 4  ;;  %v70_v35 = vsel %vm55_vm0, 0, %v69_v31  ;;  %v88_v36 = vperm.slane %v82_v33, %v546_v18  ;;  %v95_v37 = vrot.slane %v92_v32, 4 }
  0x8b   :  { %v102_v38 = vrot.slane %v70_v35, 4  ;;  %v97_v42 = vsel %vm55_vm0, %v69_v31, %v62_v30 }
  0x8c   :  { %v68_v39 = vsel %vm55_vm0, 0, %v67_v34  ;;  %v93_v40 = vrot.slane %v88_v36, 4  ;;  %v96_v41 = vsel %vm55_vm0, 0, %v95_v37  ;;  %v116_v47 = vsel %vm55_vm0, %v95_v37, %v88_v36 }
  0x8d   :  { %v103_v43 = vsel %vm55_vm0, %v102_v38, %v68_v39  ;;  %v121_v44 = vrot.slane %v96_v41, 4  ;;  %v101_v49 = vperm.slane %v97_v42, %v542_v6  ;;  %v120_v53 = vperm.slane %v116_v47, %v542_v6 }
  0x8e   :  { %v94_v45 = vsel %vm55_vm0, 0, %v93_v40  ;;  %v107_v46 = vperm.slane %v103_v43, %v542_v6 }
  0x8f   :  { %v122_v48 = vsel %vm55_vm0, %v121_v44, %v94_v45 }
  0x90   :  { %v108_v50 = vrot.slane %v107_v46, 4  ;;  %v126_v51 = vperm.slane %v122_v48, %v542_v6 }
  0x92   :  { %v109_v52 = vsel %vm55_vm0, %v108_v50, %v101_v49  ;;  %v127_v54 = vrot.slane %v126_v51, 4 }
  0x93   :  { %v113_v55 = vperm.slane %v109_v52, %v546_v18 }
  0x94   :  { %v128_v56 = vsel %vm55_vm0, %v127_v54, %v120_v53 }
  0x95   :  { %v132_v57 = vperm.slane %v128_v56, %v546_v18  ;;  %v114_v58 = vrot.slane %v113_v55, 4  ;;  %v138_v59 = vshrl.u32 %v113_v55, 16 }
  0x97   :  { %v137_v60 = vpack.i.b16 %v132_v57, %v113_v55  ;;  %v139_v61 = vshrl.u32 %v132_v57, 16  ;;  %v115_v62 = vsel %vm55_vm0, 0, %v114_v58  ;;  %v133_v63 = vrot.slane %v132_v57, 4 }
  0x98   :  { %v144_v5 = vshrl.u32 %v115_v62, 16 }
  0x99   :  { %v149_v0 = vsel %vm147_vm1, %v137_v60, 0  ;;  %v220_v1 = vsel %vm219_vm2, %v137_v60, 0  ;;  %v140_v2 = vpack.i.b16 %v139_v61, %v138_v59  ;;  %v134_v3 = vsel %vm55_vm0, 0, %v133_v63 }
  0x9a   :  { %158 = vmatpush.bf16.xpose.msra.mxu0 %v149_v0  ;;  %v143_v4 = vpack.i.b16 %v134_v3, %v115_v62  ;;  %v145_v7 = vshrl.u32 %v134_v3, 16 }
  0x9b   :  { %v165_v8 = vsel %vm147_vm1, %v140_v2, 0  ;;  %v238_v9 = vsel %vm219_vm2, %v140_v2, 0 }
  0x9c   :  { %174 = vmatpush.bf16.xpose.msra.mxu1 %v165_v8  ;;  %v181_v10 = vsel %vm147_vm1, %v143_v4, 0  ;;  %v256_v11 = vsel %vm219_vm2, %v143_v4, 0  ;;  %v146_v12 = vpack.i.b16 %v145_v7, %v144_v5 }
  0x9d   :  { %190 = vmatpush.bf16.xpose.msra.mxu2 %v181_v10 }
  0x9e   :  { %v197_v13 = vsel %vm147_vm1, %v146_v12, 0  ;;  %v274_v14 = vsel %vm219_vm2, %v146_v12, 0 }
  0x9f   :  { %206 = vmatpush.bf16.xpose.msra.mxu3 %v197_v13 }
  0xa1   :  { %449 = vmatmul.msk.bf16.vlgmr.msra.gmra.mxu0 %vm147_vm1, %v137_v60 }
  0xa2   :  { %229 = vmatpush.bf16.msrb.mxu0 %v220_v1 }
  0xa3   :  { %450 = vmatmul.msk.bf16.vlgmr.msra.gmra.mxu1 %vm147_vm1, %v140_v2 }
  0xa4   :  { %247 = vmatpush.bf16.msrb.mxu1 %v238_v9  ;;  %451 = vmatmul.msk.bf16.vlgmr.msra.gmra.mxu2 %vm147_vm1, %v143_v4 }
  0xa5   :  { %265 = vmatpush.bf16.msrb.mxu2 %v256_v11 }
  0xa6   :  { %452 = vmatmul.msk.bf16.vlgmr.msra.gmra.mxu3 %vm147_vm1, %v146_v12 }
  0xa7   :  { %283 = vmatpush.bf16.msrb.mxu3 %v274_v14 }
 0x11e   :  { %v160_v15 = vpop.f32.mrf.mxu0 }
 0x11f   :  { %v212_v16 = vpack.c.bf16 %v160_v15, %v160_v15 }
 0x120   :  { %v176_v17 = vpop.f32.mrf.mxu1 }
 0x121   :  { %v213_v19 = vpack.c.bf16 %v176_v17, %v176_v17  ;;  %453 = vmatmul.msk.bf16.vlgmr.msrb.gmra.mxu0 %vm147_vm1, %v212_v16 }
 0x123   :  { %454 = vmatmul.msk.bf16.vlgmr.msrb.gmra.mxu1 %vm147_vm1, %v213_v19 }
 0x126   :  { %v162_v20 = vpop.f32.mrf.mxu0 }
 0x127   :  { %v192_v21 = vpop.f32.mrf.mxu2 }
 0x128   :  { %v214_v22 = vpack.c.bf16 %v192_v21, %v192_v21  ;;  %v178_v23 = vpop.f32.mrf.mxu1 }
 0x129   :  { %v208_v24 = vpop.f32.mrf.mxu3 }
 0x12a   :  { %v215_v25 = vpack.c.bf16 %v208_v24, %v208_v24  ;;  %455 = vmatmul.msk.bf16.vlgmr.msrb.gmra.mxu2 %vm147_vm1, %v214_v22 }
 0x12c   :  { %456 = vmatmul.msk.bf16.vlgmr.msrb.gmra.mxu3 %vm147_vm1, %v215_v25 }
 0x12f   :  { %v194_v26 = vpop.f32.mrf.mxu2 }
 0x131   :  { %v210_v27 = vpop.f32.mrf.mxu3 }
 0x19e   :  { %v231_v28 = vpop.f32.mrf.mxu0 }
 0x19f   :  { %v289_v32 = vpack.c.bf16 %v231_v28, %v231_v28 }
 0x1a0   :  { %v249_v29 = vpop.f32.mrf.mxu1 }
 0x1a1   :  { %v290_v30 = vpack.c.bf16 %v249_v29, %v249_v29  ;;  %v296_v35 = vshrl.u32 %v289_v32, 16 }
 0x1a3   :  { %v297_v34 = vshrl.u32 %v290_v30, 16  ;;  %v295_v36 = vpack.i.b16 %v290_v30, %v289_v32 }
 0x1a5   :  { %v298_v38 = vpack.i.b16 %v297_v34, %v296_v35  ;;  %v309_v41 = vperm.slane %v295_v36, %v542_v6 }
 0x1a6   :  { %v233_v31 = vpop.f32.mrf.mxu0 }
 0x1a7   :  { %v335_v43 = vperm.slane %v298_v38, %v542_v6  ;;  %v317_v47 = vrot.slane %v309_v41, 4 }
 0x1a8   :  { %v251_v33 = vpop.f32.mrf.mxu1 }
 0x1a9   :  { %v343_v51 = vrot.slane %v335_v43, 4 }
 0x1ad   :  { %v267_v37 = vpop.f32.mrf.mxu2 }
 0x1ae   :  { %v291_v39 = vpack.c.bf16 %v267_v37, %v267_v37 }
 0x1af   :  { %v285_v40 = vpop.f32.mrf.mxu3 }
 0x1b0   :  { %v292_v42 = vpack.c.bf16 %v285_v40, %v285_v40  ;;  %v302_v44 = vshrl.u32 %v291_v39, 16 }
 0x1b2   :  { %v301_v45 = vpack.i.b16 %v292_v42, %v291_v39  ;;  %v303_v46 = vshrl.u32 %v292_v42, 16 }
 0x1b4   :  { %v304_v48 = vpack.i.b16 %v303_v46, %v302_v44  ;;  %v314_v49 = vperm.slane %v301_v45, %v542_v6 }
 0x1b5   :  { %v269_v50 = vpop.f32.mrf.mxu2 }
 0x1b6   :  { %v315_v52 = vrot.slane %v314_v49, 4  ;;  %v318_v53 = vsel %vm55_vm0, %v314_v49, %v317_v47  ;;  %v340_v54 = vperm.slane %v304_v48, %v542_v6 }
 0x1b7   :  { %v326_v55 = vperm.slane %v318_v53, %v546_v18  ;;  %v287_v56 = vpop.f32.mrf.mxu3 }
 0x1b8   :  { %v316_v57 = vsel %vm55_vm0, %v315_v52, %v309_v41  ;;  %v341_v58 = vrot.slane %v340_v54, 4  ;;  %v344_v59 = vsel %vm55_vm0, %v340_v54, %v343_v51 }
 0x1b9   :  { %v322_v60 = vperm.slane %v316_v57, %v546_v18  ;;  %v329_v61 = vrot.slane %v326_v55, 4  ;;  %v352_v62 = vperm.slane %v344_v59, %v546_v18 }
 0x1ba   :  { %v342_v63 = vsel %vm55_vm0, %v341_v58, %v335_v43 }
 0x1bb   :  { %v327_v0 = vrot.slane %v322_v60, 4  ;;  %v330_v1 = vsel %vm55_vm0, 0, %v329_v61  ;;  %v348_v2 = vperm.slane %v342_v63, %v546_v18  ;;  %v355_v3 = vrot.slane %v352_v62, 4 }
 0x1bc   :  { %v362_v4 = vrot.slane %v330_v1, 4  ;;  %v357_v9 = vsel %vm55_vm0, %v329_v61, %v322_v60 }
 0x1bd   :  { %v328_v5 = vsel %vm55_vm0, 0, %v327_v0  ;;  %v353_v7 = vrot.slane %v348_v2, 4  ;;  %v356_v8 = vsel %vm55_vm0, 0, %v355_v3  ;;  %v376_v14 = vsel %vm55_vm0, %v355_v3, %v348_v2 }
 0x1be   :  { %v363_v10 = vsel %vm55_vm0, %v362_v4, %v328_v5  ;;  %v381_v11 = vrot.slane %v356_v8, 4  ;;  %v361_v16 = vperm.slane %v357_v9, %v542_v6  ;;  %v380_v21 = vperm.slane %v376_v14, %v542_v6 }
 0x1bf   :  { %v354_v12 = vsel %vm55_vm0, 0, %v353_v7  ;;  %v367_v13 = vperm.slane %v363_v10, %v542_v6 }
 0x1c0   :  { %v382_v15 = vsel %vm55_vm0, %v381_v11, %v354_v12 }
 0x1c1   :  { %v368_v17 = vrot.slane %v367_v13, 4  ;;  %v386_v19 = vperm.slane %v382_v15, %v542_v6 }
 0x1c3   :  { %v369_v20 = vsel %vm55_vm0, %v368_v17, %v361_v16  ;;  %v387_v22 = vrot.slane %v386_v19, 4 }
 0x1c4   :  { %v373_v23 = vperm.slane %v369_v20, %v546_v18 }
 0x1c5   :  { %v388_v24 = vsel %vm55_vm0, %v387_v22, %v380_v21 }
 0x1c6   :  { %v392_v25 = vperm.slane %v388_v24, %v546_v18  ;;  %v374_v26 = vrot.slane %v373_v23, 4  ;;  %v398_v27 = vshrl.u32 %v373_v23, 16 }
 0x1c8   :  { %v399_v28 = vshrl.u32 %v392_v25, 16  ;;  %v393_v29 = vrot.slane %v392_v25, 4  ;;  %v397_v30 = vpack.i.b16 %v392_v25, %v373_v23  ;;  %v375_v32 = vsel %vm55_vm0, 0, %v374_v26 }
 0x1c9   :  { %v404_v36 = vshrl.u32 %v375_v32, 16 }
 0x1ca   :  { %v400_v31 = vpack.i.b16 %v399_v28, %v398_v27  ;;  %v394_v33 = vsel %vm55_vm0, 0, %v393_v29 }
 0x1cb   :  { %v403_v34 = vpack.i.b16 %v394_v33, %v375_v32  ;;  %v405_v35 = vshrl.u32 %v394_v33, 16 }
 0x1cc   :  { %v407_v6 = vunpack.c.l.b16 %v400_v31 }
 0x1cd   :  { %v411_v37 = vunpack.c.l.b16 %v403_v34  ;;  %v406_v40 = vpack.i.b16 %v405_v35, %v404_v36 }
 0x1ce   :  { %v408_v38 = vpack.c.b16 %v407_v6, %v407_v6 }
 0x1cf   :  { %v412_v39 = vpack.c.b16 %v411_v37, %v411_v37  ;;  %v415_v18 = vunpack.c.l.b16 %v406_v40 }
 0x1d0   :  { %409 = vrot.lane.b32.xlu1 %v408_v38, %s525_s0 }
 0x1d1   :  { %413 = vrot.lane.b32.xlu2 %v412_v39, %s526_s14  ;;  %v416_v41 = vpack.c.b16 %v415_v18, %v415_v18 }
 0x1d9   :  { %417 = vrot.lane.b32.xlu2 %v416_v41, %s527_s15 }
 0x22b   :  { %v414_v42 = vpop.permute.xlu2 %413 }
 0x233   :  { %v418_v45 = vpop.permute.xlu2 %417 }
 0x242   :  { %v410_v43 = vpop.permute.xlu1 %409 }
 0x243   :  { %v421_v44 = vsel %vm147_vm1, %v397_v30, %v410_v43 }
 0x244   :  { %v424_v46 = vsel %vm422_vm3, %v421_v44, %v414_v42 }
 0x245   :  { %v427_v47 = vsel %vm425_vm4, %v424_v46, %v418_v45 }
 0x246   :  { %v429_v48 = vunpack.c.l.bf16 %v427_v47 }
 0x248   :  { %431 = vst.msk [vmem:[#allocation5] sm:$0xff] %vm430_vm5, %v429_v48 }
 0x249   :  { %442 = dma.vmem_to_hbm [thread:$0]  %s438_s17, 128, %s440_s20, [#allocation4]  }
 0x24a   :  { %517 = dma.done.wait [#allocation4], 128  }
 0x24b   :  { %518 = vsyncadd [#allocation4], 4294967168 }
 0x24c   :  { %447 = vsyncpa [#allocation3], 1 }
 0x24d   :  { %448 = vsyncpa [#allocation4], 1 }

// kernel: autoencoder_forward.13
= control target key start
LH: loop header
LB: loop body
LE: loop exit
PB: predicated region body
PF: predicated region fallthrough
CT: control target
= control target key end

     0   :  { %s457_s15 = smov 0   ;;  %s459_s16 = smov 0   ;;  %s496_s0 = inlined_call_operand.vmem [shape: bf16[2,8,16], index: 0, kind: input, shape index: {}]   ;;  %s497_s1 = inlined_call_operand.vmem [shape: bf16[16,32], index: 1, kind: input, shape index: {}]   ;;  %s498_s2 = inlined_call_operand.vmem [shape: f32[1,32], index: 2, kind: input, shape index: {}]   ;;  %s499_s3 = inlined_call_operand.vmem [shape: f32[8,32], index: 3, kind: input, shape index: {}]   ;;  %s500_s4 = inlined_call_operand.vmem [shape: bf16[2,8,32], index: 4, kind: output, shape index: {}]  }
   0x1   :  { %s461_s17 = smov 0  }
   0x2 LB: > { %s26_s18 = sadd.s32 1, %s426_s16  ;;  %p372_p0 = scmp.ge.s32.totalorder %s430_s17, 1  ;;  %s430_s17 = sphi %s461_s17, %s14_s17   ;;  %s426_s16 = sphi %s459_s16, %s502_s16   ;;  %s422_s15 = sphi %s457_s15, %s501_s15  }
   0x3   : > { %p28_p1 = scmp.ge.s32.totalorder %s26_s18, 2  ;;  %p189_p2 = scmp.lt.s32.totalorder %s430_s17, 3 }
   0x5   : > { %s504_s18 = smov (%p28_p1, %s26_s18), 0  ;;  %p190_p3 = pnand %p372_p0, %p189_p2 }
   0x6   : > { %p223_p4 = scmp.lt.s32.totalorder (!%p190_p3), %s422_s15, 1 }
   0x7   : > { %193 = sbr.rel (%p190_p3) target bundleno = 150 (0x96), region = 36 }
   0xc   : > { %v382_v0 = vld [vmem:[%s497_s1] sm:$0xff]  ;;  %s506_s15 = smov (!%p223_p4, %s422_s15), 1  ;;  %vm255_vm0 = vcmask 130048   ;;  %vm275_vm1 = vcmask 257024  }
   0xd   : > { %266 = vmatpush.bf16.msra.mxu0 %v382_v0  ;;  %s373_s21 = sshll.u32 %s506_s15, 2  ;;  %v407_v2 = vld [vmem:[%s498_s2] ss:$0 sm:$0xff] }
   0xe   : > { %s229_s24 = scalar_lea.vmem %s496_s0, %s373_s21  ;;  %v272_v4 = vld [vmem:[%s499_s3] sm:$0xff]  ;;  %s240_s5 = scalar_lea.vmem %s500_s4, %s373_s21 }
   0xf   : > { %v242_v1 = vld [vmem:[%s229_s24] sm:$0xf] }
  0x10   : > { %379 = vmatmul.msk.bf16.vlgmr.msra.gmra.mxu0 %vm255_vm0, %v242_v1 }
  0x8d   : > { %v268_v3 = vpop.f32.mrf.mxu0 }
  0x8e   : > { %v269_v5 = vadd.f32 %v407_v2, %v268_v3 }
  0x90   : > { %v273_v6 = vadd.f32 %v272_v4, %v269_v5 }
  0x92   : > { %v274_v7 = vpack.c.bf16 %v273_v6, %v273_v6 }
  0x94   : > { %276 = vst.msk [vmem:[%s240_s5] sm:$0xf] %vm275_vm1, %v274_v7 }
  0x95   : > { %v270_v8 = vpop.f32.mrf.mxu0 }
  0x96 PF: > { %s14_s17 = sadd.s32 1, %s430_s17   ;;  %s501_s15 = smov %s426_s16 }
  0x97   : > { %p11_p5 = scmp.ge.s32.totalorder %s14_s17, 4   ;;  %s502_s16 = smov %s504_s18 }
  0x99   :  { %13 = sbr.rel (!%p11_p5) target bundleno = 2 (0x2), region = 69 }

// kernel: autoencoder_forward.14
= control target key start
LH: loop header
LB: loop body
LE: loop exit
PB: predicated region body
PF: predicated region fallthrough
CT: control target
= control target key end

     0   :  { %s846_s24 = smov 0   ;;  %s937_s0 = inlined_call_operand.vmem [shape: bf16[2,8,32], index: 0, kind: input, shape index: {}]   ;;  %s938_s1 = inlined_call_operand.vmem [shape: bf16[32,96], index: 1, kind: input, shape index: {}]   ;;  %s939_s2 = inlined_call_operand.vmem [shape: f32[1,96], index: 2, kind: input, shape index: {}]   ;;  %s940_s3 = inlined_call_operand.vmem [shape: bf16[32,32], index: 3, kind: input, shape index: {}]   ;;  %s941_s4 = inlined_call_operand.vmem [shape: f32[1,32], index: 4, kind: input, shape index: {}]   ;;  %s942_s5 = inlined_call_operand.vmem [shape: f32[1,32], index: 5, kind: input, shape index: {}]   ;;  %s943_s6 = inlined_call_operand.vmem [shape: f32[1,32], index: 6, kind: input, shape index: {}]   ;;  %s944_s7 = inlined_call_operand.vmem [shape: bf16[2,8,32], index: 7, kind: output, shape index: {}]  }
   0x1 LB: > { %s697_s25 = sadd.s32 4294967295, %s789_s24   ;;  %p701_p0 = scmp.ge.s32.totalorder %s789_s24, 1  ;;  %s789_s24 = sphi %s846_s24, %s17_s24  }
   0x2   : > { %p236_p1 = scmp.lt.s32.totalorder %s789_s24, 3 }
   0x4   : > { %p237_p2 = pnand %p701_p0, %p236_p1 }
   0x5   : > { %p266_p3 = scmp.lt.s32.totalorder (!%p237_p2), %s697_s25, 1  ;;  %s791_s13 = smov (!%p237_p2), 96  }
   0x6   : > { %240 = sbr.rel (%p237_p2) target bundleno = 1355 (0x54b), region = 48  ;;  %s792_s14 = smov (!%p237_p2), 104  }
   0x7   : > { %s793_s15 = smov (!%p237_p2), 120   ;;  %s794_s16 = smov (!%p237_p2), 88  }
   0x8   : > { %s795_s17 = smov (!%p237_p2), 80   ;;  %s796_s18 = smov (!%p237_p2), 72  }
   0x9   : > { %s797_s19 = smov (!%p237_p2), 112   ;;  %s798_s20 = smov (!%p237_p2), 64  }
   0xa   : > { %s799_s21 = smov (!%p237_p2), 40   ;;  %s800_s22 = smov (!%p237_p2), 56  }
   0xb   : > { %v733_v0 = vld [vmem:[%s938_s1 + $0x8] sm:$0xff]  ;;  %v732_v1 = vld [vmem:[%s938_s1] sm:$0xff]  ;;  %s946_s25 = smov (!%p266_p3, %s697_s25), 1  ;;  %vm296_vm0 = vcmask 261120   ;;  %vm321_vm1 = vcmask 64512   ;;  %vm358_vm2 = vcmask 1043456  }
   0xc   : > { %306 = vmatpush.bf16.msra.mxu0 %v733_v0  ;;  %s702_s30 = sshll.u32 %s946_s25, 2  ;;  %v759_v3 = vld [vmem:[%s939_s2] ss:$0 sm:$0xff]  ;;  %s801_s23 = smov 48   ;;  %vm559_vm3 = vcmask 130048   ;;  %vm561_vm4 = vcmask 195584  }
   0xd   : > { %s269_s10 = scalar_lea.vmem %s937_s0, %s702_s30  ;;  %s802_s26 = smov 8   ;;  %vm642_vm9 = vcmask 257024  }
   0xe   : > { %v868_v2 = vld [vmem:[%s269_s10] sm:$0xf]  ;;  %s803_s27 = smov 16   ;;  %s804_s28 = smov 24  }
  0x10   : > { %307 = vmatpush.bf16.msra.mxu0 %v732_v1 }
  0x13   : > { %712 = vmatmul.msk.bf16.vlgmr.msra.gmra.mxu0 %vm296_vm0, %v868_v2 }
  0x90   : > { %v309_v4 = vpop.f32.mrf.mxu0 }
  0x91   : > { %v310_v5 = vadd.f32 %v759_v3, %v309_v4 }
  0x93   : > { %v313_v6 = vmul.f32 0.35355338, %v310_v5  ;;  %v315_v7 = vpack.c.bf16 %v310_v5, %v310_v5 }
  0x95   : > { %v314_v8 = vpack.c.bf16 %v313_v6, %v313_v6  ;;  %v317_v9 = vunpack.c.l.b16 %v315_v7 }
  0x97   : > { %v875_v10 = vpack.c.b16 %v317_v9, %v317_v9  ;;  %v376_v11 = vunpack.c.l.b16 %v314_v8 }
  0x98   : > { %v311_v12 = vpop.f32.mrf.mxu0 }
  0x99   : > { %319 = vrot.lane.b32.xlu0 %v875_v10, %s791_s13  ;;  %v377_v13 = vpack.c.b16 %v376_v11, %v376_v11 }
  0x9b   : > { %490 = vrot.lane.b32.xlu2 %v377_v13, %s792_s14  ;;  %378 = vrot.lane.b32.xlu1 %v377_v13, %s793_s15 }
  0xa1   : > { %380 = vrot.lane.b32.xlu0 %v875_v10, %s794_s16 }
  0xa3   : > { %436 = vrot.lane.b32.xlu2 %v875_v10, %s795_s17  ;;  %492 = vrot.lane.b32.xlu1 %v875_v10, %s796_s18 }
  0xa9   : > { %434 = vrot.lane.b32.xlu0 %v377_v13, %s797_s19  ;;  %s273_s19 = scalar_lea.vmem %s944_s7, %s702_s30 }
  0xf5   : > { %v491_v14 = vpop.permute.xlu2 %490 }
  0xfd   : > { %v437_v15 = vpop.permute.xlu2 %436 }
  0xfe   : > { %v442_v16 = vsel %vm321_vm1, %v437_v15, 0 }
  0xff   : > { %451 = vmatpush.bf16.xpose.msrb.mxu0 %v442_v16 }
 0x10b   : > { %v320_v17 = vpop.permute.xlu0 %319 }
 0x10c   : > { %v326_v18 = vsel %vm321_vm1, %v320_v17, 0 }
 0x10d   : > { %335 = vmatpush.bf16.xpose.msra.mxu1 %v326_v18  ;;  %v379_v19 = vpop.permute.xlu1 %378 }
 0x113   : > { %v381_v20 = vpop.permute.xlu0 %380 }
 0x114   : > { %713 = vmatmul.msk.bf16.vlgmr.msra.gmra.mxu1 %vm321_vm1, %v314_v8  ;;  %v386_v21 = vsel %vm321_vm1, %v381_v20, 0 }
 0x115   : > { %395 = vmatpush.bf16.xpose.msra.mxu3 %v386_v21  ;;  %v493_v22 = vpop.permute.xlu1 %492 }
 0x116   : > { %v498_v23 = vsel %vm321_vm1, %v493_v22, 0 }
 0x11b   : > { %v435_v24 = vpop.permute.xlu0 %434 }
 0x11c   : > { %715 = vmatmul.msk.bf16.vlgmr.msra.gmra.mxu3 %vm321_vm1, %v379_v19  ;;  %717 = vmatmul.msk.bf16.vlgmr.msrb.gmra.mxu0 %vm321_vm1, %v435_v24 }
 0x11d   : > { %507 = vmatpush.bf16.xpose.msrb.mxu3 %v498_v23 }
 0x12c   : > { %719 = vmatmul.msk.bf16.vlgmr.msrb.gmra.mxu3 %vm321_vm1, %v491_v14 }
 0x191   : > { %v337_v25 = vpop.f32.mrf.mxu1 }
 0x192   : > { %v341_v26 = vsel %vm321_vm1, %v337_v25, -inf }
 0x193   : > { %342 = vmax.xlane.f32.xlu1 %v341_v26  ;;  %v735_v26 = vld [vmem:[%s940_s3 + $0x8] sm:$0xff] }
 0x194   : > { %593 = vmatpush.bf16.msra.mxu0 %v735_v26 }
 0x199   : > { %v339_v27 = vpop.f32.mrf.mxu1  ;;  %v453_v28 = vpop.f32.mrf.mxu0 }
 0x19a   : > { %v457_v33 = vsel %vm321_vm1, %v453_v28, -inf  ;;  %v734_v27 = vld [vmem:[%s940_s3] sm:$0xff] }
 0x19b   : > { %594 = vmatpush.bf16.msra.mxu0 %v734_v27 }
 0x19f   : > { %v397_v29 = vpop.f32.mrf.mxu3 }
 0x1a0   : > { %v401_v30 = vsel %vm321_vm1, %v397_v29, -inf }
 0x1a1   : > { %v455_v31 = vpop.f32.mrf.mxu0  ;;  %402 = vmax.xlane.f32.xlu2 %v401_v30 }
 0x1a7   : > { %v399_v32 = vpop.f32.mrf.mxu3 }
 0x1a9   : > { %458 = vmax.xlane.f32.xlu2 %v457_v33 }
 0x1af   : > { %v509_v34 = vpop.f32.mrf.mxu3 }
 0x1b0   : > { %v513_v35 = vsel %vm321_vm1, %v509_v34, -inf }
 0x1b1   : > { %514 = vmax.xlane.f32.xlu0 %v513_v35  ;;  %v760_v35 = vld [vmem:[%s941_s4] ss:$0 sm:$0xff] }
 0x1b7   : > { %v511_v36 = vpop.f32.mrf.mxu3 }
 0x1b8   : > { %v600_v36 = vunpack.c.l.bf16 %v868_v2 }
 0x1c1   : > { %353 = vrot.lane.b32.xlu2 %v875_v10, %s798_s20 }
 0x1c9   : > { %525 = vrot.lane.b32.xlu2 %v875_v10, %s799_s21 }
 0x206   : > { %v343_v37 = vpop.xlane.xlu1 %342 }
 0x207   : > { %v344_v38 = vsub.f32 %v337_v25, %v343_v37 }
 0x209   : > { %v345_v39 = vmul.f32 1.442695, %v344_v38 }
 0x20b   : > { %763 = vpow2.f32 %v345_v39 }
 0x211   : > { %v764_v40 = vpop.eup %763 }
 0x212   : > { %v347_v41 = vsel %vm321_vm1, %v764_v40, 0.0 }
 0x213   : > { %348 = vadd.xlane.f32.xlu1 %v347_v41 }
 0x214   : > { %v403_v42 = vpop.xlane.xlu2 %402 }
 0x215   : > { %v404_v45 = vsub.f32 %v397_v29, %v403_v42  ;;  %v805_v42 = vmov 32.0  }
 0x217   : > { %v405_v47 = vmul.f32 1.442695, %v404_v45 }
 0x21c   : > { %v459_v43 = vpop.xlane.xlu2 %458 }
 0x21d   : > { %v460_v44 = vsub.f32 %v453_v28, %v459_v43 }
 0x21f   : > { %v461_v46 = vmul.f32 1.442695, %v460_v44 }
 0x221   : > { %765 = vpow2.f32 %v461_v46 }
 0x222   : > { %767 = vpow2.f32 %v405_v47 }
 0x224   : > { %v354_v48 = vpop.permute.xlu2 %353  ;;  %v515_v49 = vpop.xlane.xlu0 %514 }
 0x225   : > { %v360_v50 = vsel %vm358_vm2, %v354_v48, 0  ;;  %v516_v52 = vsub.f32 %v509_v34, %v515_v49 }
 0x226   : > { %369 = vmatpush.bf16.msra.mxu2 %v360_v50 }
 0x227   : > { %v766_v51 = vpop.eup %765  ;;  %v517_v54 = vmul.f32 1.442695, %v516_v52 }
 0x228   : > { %v463_v53 = vsel %vm321_vm1, %v766_v51, 0.0  ;;  %v768_v55 = vpop.eup %767 }
 0x229   : > { %464 = vadd.xlane.f32.xlu0 %v463_v53  ;;  %769 = vpow2.f32 %v517_v54  ;;  %v407_v56 = vsel %vm321_vm1, %v768_v55, 0.0 }
 0x22c   : > { %413 = vrot.lane.b32.xlu1 %v875_v10, %s800_s22  ;;  %v526_v0 = vpop.permute.xlu2 %525 }
 0x22d   : > { %v531_v4 = vsel %vm358_vm2, %v526_v0, 0  ;;  %v762_v0 = vld [vmem:[%s943_s6] ss:$0 sm:$0xff] }
 0x22f   : > { %v770_v57 = vpop.eup %769 }
 0x230   : > { %v519_v58 = vsel %vm321_vm1, %v770_v57, 0.0 }
 0x231   : > { %408 = vadd.xlane.f32.xlu0 %v407_v56 }
 0x239   : > { %520 = vadd.xlane.f32.xlu0 %v519_v58 }
 0x24d   : > { %469 = vrot.lane.b32.xlu0 %v875_v10, %s801_s23 }
 0x286   : > { %v349_v59 = vpop.xlane.xlu1 %348 }
 0x287   : > { %771 = vrcp.f32 %v349_v59 }
 0x28d   : > { %v772_v60 = vpop.eup %771 }
 0x28e   : > { %v351_v61 = vmul.f32 %v772_v60, %v764_v40 }
 0x290   : > { %v352_v62 = vpack.c.bf16 %v351_v61, %v351_v61 }
 0x292   : > { %714 = vmatmul.msk.bf16.vlgmr.msra.gmra.mxu2 %vm321_vm1, %v352_v62  ;;  %v761_v62 = vld [vmem:[%s942_s5] ss:$0 sm:$0xff] }
 0x29c   : > { %v465_v63 = vpop.xlane.xlu0 %464 }
 0x29e   : > { %v414_v1 = vpop.permute.xlu1 %413 }
 0x29f   : > { %v419_v3 = vsel %vm358_vm2, %v414_v1, 0 }
 0x2a0   : > { %428 = vmatpush.bf16.msrb.mxu2 %v419_v3 }
 0x2a4   : > { %540 = vmatpush.bf16.msra.mxu2 %v531_v4  ;;  %v409_v5 = vpop.xlane.xlu0 %408 }
 0x2a5   : > { %773 = vrcp.f32 %v409_v5 }
 0x2ab   : > { %v774_v6 = vpop.eup %773 }
 0x2ac   : > { %v411_v7 = vmul.f32 %v774_v6, %v768_v55  ;;  %v521_v8 = vpop.xlane.xlu0 %520 }
 0x2ad   : > { %775 = vrcp.f32 %v521_v8 }
 0x2ae   : > { %v412_v9 = vpack.c.bf16 %v411_v7, %v411_v7  ;;  %777 = vrcp.f32 %v465_v63 }
 0x2af   : > { %779 = vrcp.f32 %v805_v42 }
 0x2b0   : > { %716 = vmatmul.msk.bf16.vlgmr.msrb.gmra.mxu2 %vm321_vm1, %v412_v9 }
 0x2b3   : > { %v776_v10 = vpop.eup %775 }
 0x2b4   : > { %v523_v11 = vmul.f32 %v776_v10, %v770_v57  ;;  %v778_v12 = vpop.eup %777 }
 0x2b5   : > { %v467_v13 = vmul.f32 %v778_v12, %v766_v51  ;;  %v780_v43 = vpop.eup %779 }
 0x2b6   : > { %v524_v14 = vpack.c.bf16 %v523_v11, %v523_v11  ;;  %v608_v44 = vmul.f32 32.0, %v780_v43  ;;  %vm612_vm5 = vweird.f32 %v780_v43 }
 0x2b7   : > { %v468_v17 = vpack.c.bf16 %v467_v13, %v467_v13 }
 0x2b8   : > { %v609_v45 = vsub.f32 1.0, %v608_v44 }
 0x2ba   : > { %v610_v46 = vmul.f32 %v780_v43, %v609_v45 }
 0x2bc   : > { %v611_v47 = vadd.f32 %v780_v43, %v610_v46 }
 0x2be   : > { %v613_v48 = vsel %vm612_vm5, %v780_v43, %v611_v47 }
 0x2bf   : > { %v470_v15 = vpop.permute.xlu0 %469 }
 0x2c0   : > { %720 = vmatmul.msk.bf16.vlgmr.msra.gmra.mxu2 %vm321_vm1, %v524_v14  ;;  %v475_v16 = vsel %vm358_vm2, %v470_v15, 0 }
 0x2c1   : > { %484 = vmatpush.bf16.msrb.mxu1 %v475_v16 }
 0x2c4   : > { %718 = vmatmul.msk.bf16.vlgmr.msrb.gmra.mxu1 %vm321_vm1, %v468_v17 }
 0x315   : > { %v371_v18 = vpop.f32.mrf.mxu2 }
 0x31d   : > { %v373_v19 = vpop.f32.mrf.mxu2 }
 0x333   : > { %v430_v20 = vpop.f32.mrf.mxu2 }
 0x334   : > { %547 = vrot.lane.b32.xlu1 %v430_v20, %s802_s26 }
 0x33b   : > { %v432_v21 = vpop.f32.mrf.mxu2 }
 0x341   : > { %v486_v22 = vpop.f32.mrf.mxu1 }
 0x342   : > { %551 = vrot.lane.b32.xlu2 %v486_v22, %s803_s27 }
 0x343   : > { %v542_v23 = vpop.f32.mrf.mxu2 }
 0x344   : > { %555 = vrot.lane.b32.xlu1 %v542_v23, %s804_s28 }
 0x349   : > { %v488_v24 = vpop.f32.mrf.mxu1 }
 0x34b   : > { %v544_v25 = vpop.f32.mrf.mxu2 }
 0x39c   : > { %v552_v30 = vpop.permute.xlu2 %551 }
 0x3a6   : > { %v548_v28 = vpop.permute.xlu1 %547 }
 0x3a7   : > { %v558_v29 = vsel %vm321_vm1, %v371_v18, %v548_v28 }
 0x3a8   : > { %v560_v32 = vsel %vm559_vm3, %v558_v29, %v552_v30 }
 0x3b6   : > { %v556_v31 = vpop.permute.xlu1 %555 }
 0x3b7   : > { %v562_v33 = vsel %vm561_vm4, %v560_v32, %v556_v31 }
 0x3b8   : > { %v563_v34 = vpack.c.bf16 %v562_v33, %v562_v33 }
 0x3ba   : > { %729 = vmatmul.msk.bf16.vlgmr.msra.gmra.mxu0 %vm296_vm0, %v563_v34 }
 0x437   : > { %v596_v37 = vpop.f32.mrf.mxu0 }
 0x438   : > { %v597_v38 = vadd.f32 %v760_v35, %v596_v37 }
 0x43a   : > { %v601_v39 = vadd.f32 %v600_v36, %v597_v38 }
 0x43c   : > { %v604_v40 = vsel %vm296_vm0, %v601_v39, 0.0 }
 0x43d   : > { %605 = vadd.xlane.f32.xlu2 %v604_v40 }
 0x43f   : > { %v598_v41 = vpop.f32.mrf.mxu0 }
 0x4b0   : > { %v606_v49 = vpop.xlane.xlu2 %605 }
 0x4b1   : > { %v614_v50 = vmul.f32 %v613_v48, %v606_v49 }
 0x4b3   : > { %v615_v51 = vsub.f32 %v601_v39, %v614_v50 }
 0x4b5   : > { %v616_v2 = vmul.f32 %v615_v51, %v615_v51 }
 0x4b7   : > { %v617_v52 = vsel %vm296_vm0, %v616_v2, 0.0 }
 0x4b8   : > { %618 = vadd.xlane.f32.xlu1 %v617_v52 }
 0x52b   : > { %v619_v53 = vpop.xlane.xlu1 %618 }
 0x52c   : > { %v620_v54 = vmul.f32 %v619_v53, %v613_v48 }
 0x52e   : > { %v621_v55 = vadd.f32 1e-05, %v620_v54 }
 0x530   : > { %781 = vrsqrt.f32 %v621_v55  ;;  %vm628_vm7 = vweird.f32 %v621_v55 }
 0x536   : > { %v782_v56 = vpop.eup %781 }
 0x537   : > { %v623_v57 = vmul.f32 %v782_v56, %v621_v55  ;;  %vm629_vm6 = vweird.f32 %v782_v56 }
 0x538   : > { %vm630_vm8 = vmor %vm628_vm7, %vm629_vm6 }
 0x539   : > { %v624_v58 = vmul.f32 %v782_v56, %v623_v57 }
 0x53b   : > { %v625_v59 = vmul.f32 0.5, %v624_v58 }
 0x53d   : > { %v626_v60 = vsub.f32 1.5, %v625_v59 }
 0x53f   : > { %v627_v61 = vmul.f32 %v782_v56, %v626_v60 }
 0x541   : > { %v631_v63 = vsel %vm630_vm8, %v782_v56, %v627_v61 }
 0x542   : > { %v632_v1 = vmul.f32 %v631_v63, %v615_v51 }
 0x544   : > { %v636_v3 = vmul.f32 %v761_v62, %v632_v1 }
 0x546   : > { %v640_v4 = vadd.f32 %v762_v0, %v636_v3 }
 0x548   : > { %v641_v5 = vpack.c.bf16 %v640_v4, %v640_v4 }
 0x54a   : > { %643 = vst.msk [vmem:[%s273_s19] sm:$0xf] %vm642_vm9, %v641_v5 }
 0x54b PF: > { %s17_s24 = sadd.s32 1, %s789_s24  }
 0x54c   : > { %p14_p4 = scmp.ge.s32.totalorder %s17_s24, 4  }
 0x54e   :  { %16 = sbr.rel (!%p14_p4) target bundleno = 1 (0x1), region = 78 }

// kernel: autoencoder_forward.17
= control target key start
LH: loop header
LB: loop body
LE: loop exit
PB: predicated region body
PF: predicated region fallthrough
CT: control target
= control target key end

     0   :  { %s784_s24 = smov 0   ;;  %s786_s25 = smov 0   ;;  %s869_s0 = inlined_call_operand.vmem [shape: bf16[2,8,32], index: 0, kind: input, shape index: {}]   ;;  %s870_s1 = inlined_call_operand.vmem [shape: bf16[32,128], index: 1, kind: input, shape index: {}]   ;;  %s871_s2 = inlined_call_operand.vmem [shape: f32[1,128], index: 2, kind: input, shape index: {}]   ;;  %s872_s3 = inlined_call_operand.vmem [shape: bf16[128,32], index: 3, kind: input, shape index: {}]   ;;  %s873_s4 = inlined_call_operand.vmem [shape: f32[1,32], index: 4, kind: input, shape index: {}]   ;;  %s874_s5 = inlined_call_operand.vmem [shape: f32[1,32], index: 5, kind: input, shape index: {}]   ;;  %s875_s6 = inlined_call_operand.vmem [shape: f32[1,32], index: 6, kind: input, shape index: {}]   ;;  %s876_s7 = inlined_call_operand.vmem [shape: f32[2,1,32], index: 7, kind: output, shape index: {}]  }
   0x1   :  { %s788_s26 = smov 0  }
   0x2 LB: > { %s29_s27 = sadd.s32 1, %s736_s25  ;;  %p629_p0 = scmp.ge.s32.totalorder %s740_s26, 1  ;;  %s740_s26 = sphi %s788_s26, %s17_s26   ;;  %s736_s25 = sphi %s786_s25, %s878_s25   ;;  %s732_s24 = sphi %s784_s24, %s877_s24  }
   0x3   : > { %p31_p1 = scmp.ge.s32.totalorder %s29_s27, 2  ;;  %p276_p2 = scmp.lt.s32.totalorder %s740_s26, 3 }
   0x5   : > { %s880_s27 = smov (%p31_p1, %s29_s27), 0  ;;  %p277_p3 = pnand %p629_p0, %p276_p2 }
   0x6   : > { %p317_p4 = scmp.lt.s32.totalorder (!%p277_p3), %s732_s24, 1 }
   0x7   : > { %280 = sbr.rel (%p277_p3) target bundleno = 576 (0x240), region = 48 }
   0xc   : > { %v675_v0 = vld [vmem:[%s870_s1 + $0x8] sm:$0xff]  ;;  %v683_v1 = vld [vmem:[%s872_s3 + $0x38] sm:$0xff]  ;;  %v674_v2 = vld [vmem:[%s870_s1] sm:$0xff]  ;;  %s882_s24 = smov (!%p317_p4, %s732_s24), 1  ;;  %vm342_vm0 = vcmask 261120   ;;  %v742_v11 = vmov 0.0  }
   0xd   : > { %375 = vmatpush.bf16.msra.mxu0 %v675_v0  ;;  %449 = vmatpush.bf16.msra.mxu1 %v683_v1  ;;  %v682_v3 = vld [vmem:[%s872_s3 + $0x30] sm:$0xff]  ;;  %s630_s13 = sshll.u32 %s882_s24, 2  ;;  %v681_v5 = vld [vmem:[%s872_s3 + $0x28] sm:$0xff]  ;;  %v680_v6 = vld [vmem:[%s872_s3 + $0x20] sm:$0xff]  ;;  %343 = vst.msk [vmem:[#allocation2] sm:$0xff] %vm342_vm0, %v742_v11  ;;  %v743_v28 = vmov 32.0   ;;  %s336_s20 = scalar_lea.vmem %s876_s7, %s882_s24 }
   0xe   : > { %s320_s16 = scalar_lea.vmem %s869_s0, %s630_s13  ;;  %v679_v7 = vld [vmem:[%s872_s3 + $0x18] sm:$0xff]  ;;  %v678_v8 = vld [vmem:[%s872_s3 + $0x10] sm:$0xff]  ;;  %v677_v9 = vld [vmem:[%s872_s3 + $0x8] sm:$0xff]  ;;  %714 = vrcp.f32 %v743_v28  ;;  %vm522_vm5 = vcmask 253952  }
   0xf   : > { %v344_v4 = vld [vmem:[%s320_s16] sm:$0xf] }
  0x10   : > { %v676_v10 = vld [vmem:[%s872_s3] sm:$0xff]  ;;  %v473_v23 = vunpack.c.l.bf16 %v344_v4 }
  0x11   : > { %376 = vmatpush.bf16.msra.mxu0 %v674_v2  ;;  %450 = vmatpush.bf16.msra.mxu1 %v682_v3  ;;  %v710_v12 = vld [vmem:[%s871_s2] ss:$0 sm:$0xff] }
  0x12   : > { %v711_v21 = vld [vmem:[%s873_s4] ss:$0 sm:$0xff] }
  0x13   : > { %v712_v49 = vld [vmem:[%s874_s5] ss:$0 sm:$0xff] }
  0x14   : > { %639 = vmatmul.msk.bf16.vlgmr.msra.gmra.mxu0 %vm342_vm0, %v344_v4  ;;  %v383_v18 = vld [vmem:[#allocation2] sm:$0xff]  ;;  %v715_v29 = vpop.eup %714 }
  0x15   : > { %451 = vmatpush.bf16.msra.mxu1 %v681_v5  ;;  %v481_v30 = vmul.f32 32.0, %v715_v29  ;;  %vm485_vm1 = vweird.f32 %v715_v29  ;;  %v713_v51 = vld [vmem:[%s875_s6] ss:$0 sm:$0xff] }
  0x17   : > { %v482_v31 = vsub.f32 1.0, %v481_v30 }
  0x19   : > { %452 = vmatpush.bf16.msra.mxu1 %v680_v6  ;;  %v483_v32 = vmul.f32 %v715_v29, %v482_v31 }
  0x1b   : > { %v484_v33 = vadd.f32 %v715_v29, %v483_v32 }
  0x1d   : > { %453 = vmatpush.bf16.msra.mxu1 %v679_v7  ;;  %v486_v34 = vsel %vm485_vm1, %v715_v29, %v484_v33 }
  0x21   : > { %454 = vmatpush.bf16.msra.mxu1 %v678_v8 }
  0x25   : > { %455 = vmatpush.bf16.msra.mxu1 %v677_v9 }
  0x29   : > { %456 = vmatpush.bf16.msra.mxu1 %v676_v10 }
  0x91   : > { %v378_v13 = vpop.f32.mrf.mxu0 }
  0x92   : > { %v379_v14 = vadd.f32 %v710_v12, %v378_v13 }
  0x94   : > { %v382_v15 = vmax.f32 %v379_v14, 0.0 }
  0x96   : > { %v384_v16 = vpack.c.bf16 %v382_v15, %v382_v15 }
  0x98   : > { %457 = vmatmul.bf16.vlgmr.msra.gmra.mxu1 %v384_v16 }
  0x99   : > { %v380_v17 = vpop.f32.mrf.mxu0 }
 0x115   : > { %v458_v19 = vpop.f32.mrf.mxu1 }
 0x116   : > { %v462_v20 = vadd.f32 %v458_v19, %v383_v18 }
 0x118   : > { %463 = vst.msk [vmem:[#allocation2] sm:$0xff] %vm342_vm0, %v462_v20 }
 0x11d   : > { %v460_v22 = vpop.f32.mrf.mxu1 }
 0x11f   : > { %v467_v24 = vld [vmem:[#allocation2] sm:$0xff] }
 0x120   : > { %v472_v25 = vadd.f32 %v711_v21, %v467_v24 }
 0x122   : > { %v474_v26 = vadd.f32 %v473_v23, %v472_v25 }
 0x124   : > { %v477_v27 = vsel %vm342_vm0, %v474_v26, 0.0 }
 0x125   : > { %478 = vadd.xlane.f32.xlu0 %v477_v27 }
 0x198   : > { %v479_v35 = vpop.xlane.xlu0 %478 }
 0x199   : > { %v487_v36 = vmul.f32 %v486_v34, %v479_v35 }
 0x19b   : > { %v488_v37 = vsub.f32 %v474_v26, %v487_v36 }
 0x19d   : > { %v489_v38 = vmul.f32 %v488_v37, %v488_v37 }
 0x19f   : > { %v490_v39 = vsel %vm342_vm0, %v489_v38, 0.0 }
 0x1a0   : > { %491 = vadd.xlane.f32.xlu0 %v490_v39 }
 0x213   : > { %v492_v40 = vpop.xlane.xlu0 %491 }
 0x214   : > { %v493_v41 = vmul.f32 %v492_v40, %v486_v34 }
 0x216   : > { %v494_v42 = vadd.f32 1e-05, %v493_v41 }
 0x218   : > { %716 = vrsqrt.f32 %v494_v42  ;;  %vm501_vm3 = vweird.f32 %v494_v42 }
 0x21e   : > { %v717_v43 = vpop.eup %716 }
 0x21f   : > { %v496_v44 = vmul.f32 %v717_v43, %v494_v42  ;;  %vm502_vm2 = vweird.f32 %v717_v43 }
 0x220   : > { %vm503_vm4 = vmor %vm501_vm3, %vm502_vm2 }
 0x221   : > { %v497_v45 = vmul.f32 %v717_v43, %v496_v44 }
 0x223   : > { %v498_v46 = vmul.f32 0.5, %v497_v45 }
 0x225   : > { %v499_v47 = vsub.f32 1.5, %v498_v46 }
 0x227   : > { %v500_v48 = vmul.f32 %v717_v43, %v499_v47 }
 0x229   : > { %v504_v50 = vsel %vm503_vm4, %v717_v43, %v500_v48 }
 0x22a   : > { %v505_v52 = vmul.f32 %v504_v50, %v488_v37 }
 0x22c   : > { %v509_v53 = vmul.f32 %v712_v49, %v505_v52 }
 0x22e   : > { %v513_v54 = vadd.f32 %v713_v51, %v509_v53 }
 0x230   : > { %v514_v55 = vsel %vm342_vm0, %v513_v54, 0.0 }
 0x231   : > { %v515_v56 = vrot.slane %v514_v55, 4 }
 0x233   : > { %v516_v57 = vadd.f32 %v515_v56, %v514_v55 }
 0x235   : > { %v517_v58 = vrot.slane %v516_v57, 2 }
 0x237   : > { %v518_v59 = vadd.f32 %v517_v58, %v516_v57 }
 0x239   : > { %v519_v60 = vrot.slane %v518_v59, 1 }
 0x23b   : > { %v520_v61 = vadd.f32 %v519_v60, %v518_v59 }
 0x23d   : > { %v521_v62 = vmul.f32 0.125, %v520_v61 }
 0x23f   : > { %523 = vst.msk [vmem:[%s336_s20] sm:$0x1] %vm522_vm5, %v521_v62 }
 0x240 PF: > { %s17_s26 = sadd.s32 1, %s740_s26   ;;  %s877_s24 = smov %s736_s25 }
 0x241   : > { %p14_p5 = scmp.ge.s32.totalorder %s17_s26, 4   ;;  %s878_s25 = smov %s880_s27 }
 0x243   :  { %16 = sbr.rel (!%p14_p5) target bundleno = 2 (0x2), region = 95 }

// kernel: autoencoder_forward.18
= control target key start
LH: loop header
LB: loop body
LE: loop exit
PB: predicated region body
PF: predicated region fallthrough
CT: control target
= control target key end

     0   :  { %vm36_vm0 = vcmask 261120   ;;  %vm53_vm1 = vcmask 254976   ;;  %s106_s1 = inlined_call_operand.vmem [shape: bf16[32,32], index: 1, kind: input, shape index: {}]   ;;  %s107_s2 = inlined_call_operand.vmem [shape: f32[1,32], index: 2, kind: input, shape index: {}]   ;;  %s108_s0 = inlined_call_operand.vmem [shape: bf16[2,32], index: 0, kind: input, shape index: {}]   ;;  %s109_s3 = inlined_call_operand.vmem [shape: f32[2,32], index: 3, kind: output, shape index: {}]  }
   0x1   :  { %v69_v0 = vld [vmem:[%s106_s1 + $0x8] sm:$0xff]  ;;  %v68_v1 = vld [vmem:[%s106_s1] sm:$0xff] }
   0x2   :  { %46 = vmatpush.bf16.msra.mxu0 %v69_v0  ;;  %v15_v2 = vld [vmem:[%s108_s0] sm:$0x1] }
   0x3   :  { %v70_v3 = vld [vmem:[%s107_s2] ss:$0 sm:$0xff] }
   0x6   :  { %47 = vmatpush.bf16.msra.mxu0 %v68_v1 }
   0x9   :  { %67 = vmatmul.msk.bf16.vlgmr.msra.gmra.mxu0 %vm36_vm0, %v15_v2 }
  0x86   :  { %v49_v4 = vpop.f32.mrf.mxu0 }
  0x87   :  { %v50_v5 = vadd.f32 %v70_v3, %v49_v4 }
  0x89   :  { %54 = vst.msk [vmem:[%s109_s3] sm:$0x3] %vm53_vm1, %v50_v5 }
  0x8e   :  { %v51_v6 = vpop.f32.mrf.mxu0 }

// kernel: autoencoder_forward.15
= control target key start
LH: loop header
LB: loop body
LE: loop exit
PB: predicated region body
PF: predicated region fallthrough
CT: control target
= control target key end

     0   :  { %vm31_vm0 = vcmask 261120   ;;  %v321_v11 = vmov 0.0   ;;  %v322_v38 = vmov 32.0   ;;  %vm246_vm6 = vcmask 257024   ;;  %s426_s1 = inlined_call_operand.vmem [shape: bf16[32,128], index: 1, kind: input, shape index: {}]   ;;  %s427_s3 = inlined_call_operand.vmem [shape: bf16[128,32], index: 3, kind: input, shape index: {}]   ;;  %s428_s2 = inlined_call_operand.vmem [shape: f32[1,128], index: 2, kind: input, shape index: {}]   ;;  %s429_s0 = inlined_call_operand.vmem [shape: bf16[16,32], index: 0, kind: input, shape index: {}]   ;;  %s430_s4 = inlined_call_operand.vmem [shape: f32[1,32], index: 4, kind: input, shape index: {}]   ;;  %s431_s5 = inlined_call_operand.vmem [shape: f32[1,32], index: 5, kind: input, shape index: {}]   ;;  %s432_s6 = inlined_call_operand.vmem [shape: f32[1,32], index: 6, kind: input, shape index: {}]   ;;  %s433_s7 = inlined_call_operand.vmem [shape: bf16[16,32], index: 7, kind: output, shape index: {}]  }
   0x1   :  { %v300_v0 = vld [vmem:[%s426_s1 + $0x8] sm:$0xff]  ;;  %v308_v1 = vld [vmem:[%s427_s3 + $0x38] sm:$0xff]  ;;  %v299_v2 = vld [vmem:[%s426_s1] sm:$0xff]  ;;  %32 = vst.msk [vmem:[#allocation2] sm:$0xff] %vm31_vm0, %v321_v11  ;;  %315 = vrcp.f32 %v322_v38 }
   0x2   :  { %71 = vmatpush.bf16.msra.mxu0 %v300_v0  ;;  %148 = vmatpush.bf16.msra.mxu1 %v308_v1  ;;  %v307_v3 = vld [vmem:[%s427_s3 + $0x30] sm:$0xff]  ;;  %v298_v4 = vld [vmem:[%s429_s0] sm:$0xff]  ;;  %v306_v5 = vld [vmem:[%s427_s3 + $0x28] sm:$0xff]  ;;  %33 = vst.msk [vmem:[#allocation2 + $0x8] sm:$0xff] %vm31_vm0, %v321_v11 }
   0x3   :  { %v305_v6 = vld [vmem:[%s427_s3 + $0x20] sm:$0xff]  ;;  %v304_v7 = vld [vmem:[%s427_s3 + $0x18] sm:$0xff]  ;;  %v303_v8 = vld [vmem:[%s427_s3 + $0x10] sm:$0xff] }
   0x4   :  { %v302_v9 = vld [vmem:[%s427_s3 + $0x8] sm:$0xff]  ;;  %v301_v10 = vld [vmem:[%s427_s3] sm:$0xff] }
   0x5   :  { %v311_v13 = vld [vmem:[%s428_s2] ss:$0 sm:$0xff] }
   0x6   :  { %72 = vmatpush.bf16.msra.mxu0 %v299_v2  ;;  %149 = vmatpush.bf16.msra.mxu1 %v307_v3  ;;  %v34_v24 = vld [vmem:[%s429_s0] sm:$0xff]  }
   0x7   :  { %v312_v25 = vld [vmem:[%s430_s4] ss:$0 sm:$0xff]  ;;  %v177_v28 = vunpack.c.l.bf16 %v34_v24  ;;  %v178_v33 = vunpack.c.h.bf16 %v34_v24  ;;  %v316_v39 = vpop.eup %315 }
   0x8   :  { %v81_v20 = vld [vmem:[#allocation2] sm:$0xff]  ;;  %v190_v40 = vmul.f32 32.0, %v316_v39  ;;  %vm194_vm1 = vweird.f32 %v316_v39 }
   0x9   :  { %265 = vmatmul.msk.bf16.vlgmr.msra.gmra.mxu0 %vm31_vm0, %v298_v4  ;;  %v82_v23 = vld [vmem:[#allocation2 + $0x8] sm:$0xff] }
   0xa   :  { %150 = vmatpush.bf16.msra.mxu1 %v306_v5  ;;  %v191_v41 = vsub.f32 1.0, %v190_v40  ;;  %v313_v5 = vld [vmem:[%s431_s5] ss:$0 sm:$0xff] }
   0xc   :  { %v192_v42 = vmul.f32 %v316_v39, %v191_v41 }
   0xe   :  { %151 = vmatpush.bf16.msra.mxu1 %v305_v6  ;;  %v193_v43 = vadd.f32 %v316_v39, %v192_v42 }
  0x10   :  { %v195_v44 = vsel %vm194_vm1, %v316_v39, %v193_v43 }
  0x12   :  { %152 = vmatpush.bf16.msra.mxu1 %v304_v7 }
  0x16   :  { %153 = vmatpush.bf16.msra.mxu1 %v303_v8  ;;  %v314_v8 = vld [vmem:[%s432_s6] ss:$0 sm:$0xff] }
  0x1a   :  { %154 = vmatpush.bf16.msra.mxu1 %v302_v9 }
  0x1e   :  { %155 = vmatpush.bf16.msra.mxu1 %v301_v10 }
  0x86   :  { %v74_v12 = vpop.f32.mrf.mxu0 }
  0x87   :  { %v75_v14 = vadd.f32 %v311_v13, %v74_v12 }
  0x89   :  { %v79_v17 = vmax.f32 %v75_v14, 0.0 }
  0x8e   :  { %v76_v15 = vpop.f32.mrf.mxu0 }
  0x8f   :  { %v77_v16 = vadd.f32 %v311_v13, %v76_v15 }
  0x91   :  { %v80_v18 = vmax.f32 %v77_v16, 0.0 }
  0x93   :  { %v83_v19 = vpack.c.bf16 %v80_v18, %v79_v17 }
  0x95   :  { %156 = vmatmul.bf16.vlgmr.msra.gmra.mxu1 %v83_v19 }
 0x112   :  { %v157_v21 = vpop.f32.mrf.mxu1 }
 0x113   :  { %v162_v22 = vadd.f32 %v157_v21, %v81_v20 }
 0x115   :  { %164 = vst.msk [vmem:[#allocation2] sm:$0xff] %vm31_vm0, %v162_v22 }
 0x11a   :  { %v159_v26 = vpop.f32.mrf.mxu1 }
 0x11b   :  { %v163_v27 = vadd.f32 %v159_v26, %v82_v23 }
 0x11c   :  { %v169_v29 = vld [vmem:[#allocation2] sm:$0xff] }
 0x11d   :  { %165 = vst.msk [vmem:[#allocation2 + $0x8] sm:$0xff] %vm31_vm0, %v163_v27  ;;  %v175_v30 = vadd.f32 %v312_v25, %v169_v29 }
 0x11f   :  { %v179_v31 = vadd.f32 %v177_v28, %v175_v30 }
 0x121   :  { %v183_v32 = vsel %vm31_vm0, %v179_v31, 0.0 }
 0x122   :  { %184 = vadd.xlane.f32.xlu0 %v183_v32 }
 0x124   :  { %v170_v34 = vld [vmem:[#allocation2 + $0x8] sm:$0xff] }
 0x125   :  { %v176_v35 = vadd.f32 %v312_v25, %v170_v34 }
 0x127   :  { %v180_v36 = vadd.f32 %v178_v33, %v176_v35 }
 0x129   :  { %v186_v37 = vsel %vm31_vm0, %v180_v36, 0.0 }
 0x12a   :  { %187 = vadd.xlane.f32.xlu0 %v186_v37 }
 0x195   :  { %v185_v45 = vpop.xlane.xlu0 %184 }
 0x196   :  { %v196_v46 = vmul.f32 %v195_v44, %v185_v45 }
 0x198   :  { %v198_v47 = vsub.f32 %v179_v31, %v196_v46 }
 0x19a   :  { %v200_v48 = vmul.f32 %v198_v47, %v198_v47 }
 0x19c   :  { %v202_v49 = vsel %vm31_vm0, %v200_v48, 0.0 }
 0x19d   :  { %203 = vadd.xlane.f32.xlu1 %v202_v49  ;;  %v188_v50 = vpop.xlane.xlu0 %187 }
 0x19e   :  { %v197_v51 = vmul.f32 %v195_v44, %v188_v50 }
 0x1a0   :  { %v199_v52 = vsub.f32 %v180_v36, %v197_v51 }
 0x1a2   :  { %v201_v53 = vmul.f32 %v199_v52, %v199_v52 }
 0x1a4   :  { %v205_v54 = vsel %vm31_vm0, %v201_v53, 0.0 }
 0x1a5   :  { %206 = vadd.xlane.f32.xlu1 %v205_v54 }
 0x210   :  { %v204_v55 = vpop.xlane.xlu1 %203 }
 0x211   :  { %v208_v56 = vmul.f32 %v204_v55, %v195_v44 }
 0x213   :  { %v210_v57 = vadd.f32 1e-05, %v208_v56 }
 0x215   :  { %317 = vrsqrt.f32 %v210_v57  ;;  %vm218_vm3 = vweird.f32 %v210_v57 }
 0x218   :  { %v207_v58 = vpop.xlane.xlu1 %206 }
 0x219   :  { %v209_v59 = vmul.f32 %v207_v58, %v195_v44 }
 0x21b   :  { %v318_v60 = vpop.eup %317  ;;  %v211_v61 = vadd.f32 1e-05, %v209_v59 }
 0x21c   :  { %v213_v62 = vmul.f32 %v318_v60, %v210_v57  ;;  %vm219_vm2 = vweird.f32 %v318_v60 }
 0x21d   :  { %319 = vrsqrt.f32 %v211_v61  ;;  %vm220_vm4 = vmor %vm218_vm3, %vm219_vm2  ;;  %vm228_vm7 = vweird.f32 %v211_v61 }
 0x21e   :  { %v214_v63 = vmul.f32 %v318_v60, %v213_v62 }
 0x220   :  { %v215_v0 = vmul.f32 0.5, %v214_v63 }
 0x222   :  { %v216_v1 = vsub.f32 1.5, %v215_v0 }
 0x223   :  { %v320_v2 = vpop.eup %319 }
 0x224   :  { %v217_v3 = vmul.f32 %v318_v60, %v216_v1  ;;  %v223_v4 = vmul.f32 %v320_v2, %v211_v61  ;;  %vm229_vm5 = vweird.f32 %v320_v2 }
 0x225   :  { %vm230_vm8 = vmor %vm228_vm7, %vm229_vm5 }
 0x226   :  { %v221_v6 = vsel %vm220_vm4, %v318_v60, %v217_v3  ;;  %v224_v7 = vmul.f32 %v320_v2, %v223_v4 }
 0x227   :  { %v232_v9 = vmul.f32 %v221_v6, %v198_v47 }
 0x228   :  { %v225_v10 = vmul.f32 0.5, %v224_v7 }
 0x229   :  { %v237_v11 = vmul.f32 %v313_v5, %v232_v9 }
 0x22a   :  { %v226_v12 = vsub.f32 1.5, %v225_v10 }
 0x22b   :  { %v242_v13 = vadd.f32 %v314_v8, %v237_v11 }
 0x22c   :  { %v227_v14 = vmul.f32 %v320_v2, %v226_v12 }
 0x22d   :  { %v244_v15 = vpack.c.bf16 %v242_v13, %v242_v13 }
 0x22e   :  { %v231_v16 = vsel %vm230_vm8, %v320_v2, %v227_v14 }
 0x22f   :  { %247 = vst.msk [vmem:[%s433_s7] sm:$0xf] %vm246_vm6, %v244_v15  ;;  %v233_v17 = vmul.f32 %v231_v16, %v199_v52 }
 0x231   :  { %v238_v18 = vmul.f32 %v313_v5, %v233_v17 }
 0x233   :  { %v243_v19 = vadd.f32 %v314_v8, %v238_v18 }
 0x235   :  { %v245_v20 = vpack.c.bf16 %v243_v19, %v243_v19 }
 0x237   :  { %248 = vst.msk [vmem:[%s433_s7 + $0x4] sm:$0xf] %vm246_vm6, %v245_v20 }

// kernel: autoencoder_forward.20
= control target key start
LH: loop header
LB: loop body
LE: loop exit
PB: predicated region body
PF: predicated region fallthrough
CT: control target
= control target key end

     0   :  { %s339_s9 = smov 0   ;;  %s341_s10 = smov 0   ;;  %s363_s0 = inlined_call_operand.vmem [shape: f32[2,1,32], index: 0, kind: input, shape index: {}]   ;;  %s364_s1 = inlined_call_operand.vmem [shape: f32[8,32], index: 1, kind: input, shape index: {}]   ;;  %s365_s2 = inlined_call_operand.vmem [shape: bf16[2,8,32], index: 2, kind: output, shape index: {}]  }
   0x1   :  { %s343_s11 = smov 0  }
   0x2 LB: > { %s24_s12 = sadd.s32 1, %s318_s10  ;;  %p271_p0 = scmp.ge.s32.totalorder %s322_s11, 1  ;;  %s322_s11 = sphi %s343_s11, %s12_s11   ;;  %s318_s10 = sphi %s341_s10, %s367_s10   ;;  %s314_s9 = sphi %s339_s9, %s366_s9  }
   0x3   : > { %p26_p1 = scmp.ge.s32.totalorder %s24_s12, 2  ;;  %p133_p2 = scmp.lt.s32.totalorder %s322_s11, 3 }
   0x5   : > { %s369_s12 = smov (%p26_p1, %s24_s12), 0  ;;  %p134_p3 = pnand %p271_p0, %p133_p2 }
   0x6   : > { %p159_p4 = scmp.lt.s32.totalorder (!%p134_p3), %s314_s9, 1 }
   0x7   : > { %137 = sbr.rel (%p134_p3) target bundleno = 20 (0x14), region = 28 }
   0xc   : > { %s371_s9 = smov (!%p159_p4, %s314_s9), 1  ;;  %v174_v0 = vld [vmem:[%s364_s1] sm:$0xff]  ;;  %vm180_vm0 = vcmask 257024  }
   0xd   : > { %s161_s15 = scalar_lea.vmem %s363_s0, %s371_s9  ;;  %s272_s18 = sshll.u32 %s371_s9, 2 }
   0xe   : > { %v299_v1 = vld [vmem:[%s161_s15] ss:$0 sm:$0xff]  ;;  %s172_s21 = scalar_lea.vmem %s365_s2, %s272_s18 }
   0xf   : > { %v178_v2 = vadd.f32 %v299_v1, %v174_v0 }
  0x11   : > { %v179_v3 = vpack.c.bf16 %v178_v2, %v178_v2 }
  0x13   : > { %181 = vst.msk [vmem:[%s172_s21] sm:$0xf] %vm180_vm0, %v179_v3 }
  0x14 PF: > { %s12_s11 = sadd.s32 1, %s322_s11   ;;  %s366_s9 = smov %s318_s10 }
  0x15   : > { %p9_p5 = scmp.ge.s32.totalorder %s12_s11, 4   ;;  %s367_s10 = smov %s369_s12 }
  0x17   :  { %11 = sbr.rel (!%p9_p5) target bundleno = 2 (0x2), region = 61 }

// kernel: autoencoder_forward.25
= control target key start
LH: loop header
LB: loop body
LE: loop exit
PB: predicated region body
PF: predicated region fallthrough
CT: control target
= control target key end

     0   :  { %s166_s0 = inlined_call_operand.vmem [shape: bf16[16,32], index: 0, kind: input, shape index: {}]   ;;  %s167_s1 = inlined_call_operand.vmem [shape: bf16[32,16], index: 1, kind: input, shape index: {}]   ;;  %s168_s2 = inlined_call_operand.vmem [shape: f32[1,16], index: 2, kind: input, shape index: {}]   ;;  %s169_s3 = inlined_call_operand.hbm [shape: f32[16,16], index: 3, kind: output, shape index: {}]  }
   0x1   :  { %v97_v0 = vld [vmem:[%s167_s1 + $0x8] sm:$0xff] }
   0x2   :  { %8 = vsyncpa [#allocation3], 0  ;;  %53 = vmatpush.bf16.msra.mxu0 %v97_v0  ;;  %v96_v1 = vld [vmem:[%s167_s1] sm:$0xff]  ;;  %vm43_vm0 = vcmask 261120   ;;  %vm61_vm1 = vcmask 130048   ;;  %s128_s20 = smov [#allocation2]  }
   0x3   :  { %v95_v2 = vld [vmem:[%s166_s0] sm:$0xff]  ;;  %s68_s21 = sshll.u32 %s128_s20, 4  ;;  %s70_s1 = sshll.u32 %s169_s3, 4  ;;  %s69_s21 = int_to_ptr.vmem [resolvable:$true] %s68_s21  ;;  %s71_s1 = int_to_ptr.hbm [resolvable:$true] %s70_s1 }
   0x4   :  { %v101_v3 = vld [vmem:[%s168_s2] ss:$0 sm:$0xff]  ;;  %s129_s0 = smov 128   ;;  %s130_s24 = smov 8  }
   0x6   :  { %54 = vmatpush.bf16.msra.mxu0 %v96_v1 }
   0x9   :  { %94 = vmatmul.msk.bf16.vlgmr.msra.gmra.mxu0 %vm43_vm0, %v95_v2 }
  0x86   :  { %v56_v4 = vpop.f32.mrf.mxu0 }
  0x87   :  { %v57_v5 = vadd.f32 %v101_v3, %v56_v4 }
  0x89   :  { %62 = vst.msk [vmem:[#allocation2] sm:$0xff] %vm61_vm1, %v57_v5 }
  0x8e   :  { %v58_v6 = vpop.f32.mrf.mxu0 }
  0x8f   :  { %v59_v7 = vadd.f32 %v101_v3, %v58_v6 }
  0x91   :  { %63 = vst.msk [vmem:[#allocation2 + $0x8] sm:$0xff] %vm61_vm1, %v59_v7 }
  0x92   :  { %76 = dma.vmem_to_hbm [thread:$0]  %s69_s21, 256, %s71_s1, [#allocation3], %s129_s0, %s129_s0, %s130_s24  }
  0x93   :  { %126 = dma.done.wait [#allocation3], 256  }
  0x94   :  { %127 = vsyncadd [#allocation3], 4294967040 }
  0x95   :  { %81 = vsyncpa [#allocation3], 1 }

</bundles_post_ra>
